<compile_context>
chip_gen: v7x
topology: tpu7x:2x2x1
jax: 0.10.0
libtpu: 0.0.40
codegen_flags: <defaults>
</compile_context>

<pallas_src>
import math

import jax
import jax.numpy as jnp
from jax import lax
from jax.experimental import pallas as pl
from jax.experimental.pallas import tpu as pltpu

# ---- module hyper-parameters (small, synthetic) --------------------------------
D_MODEL = 32
NHEAD = 4
HEAD_DIM = D_MODEL // NHEAD
DIM_FF = 64
NUM_LAYERS = 3
AUX_LAYERS = [0]                 # must not contain NUM_LAYERS - 1
BASICNORM_EPS = 0.25             # BasicNorm: exp(log(0.25)) with default learnable eps

assert NUM_LAYERS - 1 not in AUX_LAYERS


# ================================ Pallas kernel =================================
def _encoder_stack_kernel(x_ref, wqkv_ref, bqkv_ref, wo_ref, bo_ref,
                          w1_ref, b1_ref, w2_ref, b2_ref, o_ref):
    """All NUM_LAYERS encoder layers for ONE batch element: x_ref block is (1, S, C)."""
    C, H, HD, F = D_MODEL, NHEAD, HEAD_DIM, DIM_FF

    x = x_ref[0].astype(jnp.float32)                              # (S, C), resident

    for l in range(NUM_LAYERS):                                   # static unroll
        # ---- multi-head self-attention (scale pre-folded into W_q / b_q) -------
        qkv = jnp.dot(x.astype(jnp.bfloat16), wqkv_ref[l],
                      preferred_element_type=jnp.float32) + bqkv_ref[l]     # (S, 3C)

        heads = []
        for h in range(H):                                        # static unroll
            qh = qkv[:, 0 * C + h * HD: 0 * C + (h + 1) * HD].astype(jnp.bfloat16)
            kh = qkv[:, 1 * C + h * HD: 1 * C + (h + 1) * HD].astype(jnp.bfloat16)
            vh = qkv[:, 2 * C + h * HD: 2 * C + (h + 1) * HD].astype(jnp.bfloat16)
            # scores[i, j] = qh[i] . kh[j]   (no explicit K transpose)
            s_h = lax.dot_general(qh, kh, (((1,), (1,)), ((), ())),
                                  preferred_element_type=jnp.float32)       # (S, S)
            s_h = s_h - jnp.max(s_h, axis=-1, keepdims=True)
            p = jnp.exp(s_h)
            p = p * pl.reciprocal(jnp.sum(p, axis=-1, keepdims=True), approx=True)
            heads.append(jnp.dot(p.astype(jnp.bfloat16), vh,
                                 preferred_element_type=jnp.float32))       # (S, HD)

        # Heads occupy static lane offsets inside one 128-lane tile -> cheap concat,
        # then a single K=C output projection (instead of NHEAD K=HD MXU passes).
        ctx = jnp.concatenate(heads, axis=-1).astype(jnp.bfloat16)          # (S, C)
        attn = jnp.dot(ctx, wo_ref[l], preferred_element_type=jnp.float32) + bo_ref[l]

        src = x + attn                                                      # residual 1

        # ---- feed-forward: ScaledLinear -> DoubleSwish -> ScaledLinear ---------
        hdn = jnp.dot(src.astype(jnp.bfloat16), w1_ref[l],
                      preferred_element_type=jnp.float32) + b1_ref[l]       # (S, F)
        hdn = hdn * jax.nn.sigmoid(hdn - 1.0)                               # DoubleSwish
        ff = jnp.dot(hdn.astype(jnp.bfloat16), w2_ref[l],
                     preferred_element_type=jnp.float32) + b2_ref[l]

        src = src + ff                                                      # residual 2

        # ---- BasicNorm: x * (mean(x^2, -1) + eps)^-0.5 --------------------------
        x = src * lax.rsqrt(jnp.mean(src * src, axis=-1, keepdims=True) + BASICNORM_EPS)

    o_ref[0] = x.astype(o_ref.dtype)


# ============================== encoder wrapper =================================
def transformer_encoder_forward(src_snc, stacked_params):
    """src: (S, N, C) -> (S, N, C), matching TransformerEncoder.forward (eval mode)."""
    S, N, C = src_snc.shape
    assert C == D_MODEL
    L, F = NUM_LAYERS, DIM_FF

    # One-time wrapper transpose so the batch axis is leading and each grid step's
    # block (1, S, C) has legal (full-dim) last-two block dims.
    x_nsc = jnp.transpose(src_snc, (1, 0, 2))

    def _resident(arr):
        nd = arr.ndim
        # Full-array block, constant index map -> DMA'd once, resident across grid.
        return pl.BlockSpec(arr.shape, lambda n, _nd=nd: (0,) * _nd)

    in_specs = [pl.BlockSpec((1, S, C), lambda n: (n, 0, 0))]
    in_specs += [_resident(p) for p in stacked_params]
    out_specs = pl.BlockSpec((1, S, C), lambda n: (n, 0, 0))

    # Advisory cost estimate for XLA scheduling around the call.
    flops = 2 * N * L * S * (C * 3 * C + 2 * S * C + C * C + 2 * C * F)
    transcendentals = N * L * (NHEAD * S * S + S * F + NHEAD * S + S)
    bytes_accessed = 2 * src_snc.size * 4 + sum(
        int(p.size) * p.dtype.itemsize for p in stacked_params)

    out_nsc = pl.pallas_call(
        _encoder_stack_kernel,
        out_shape=jax.ShapeDtypeStruct((N, S, C), src_snc.dtype),
        grid=(N,),
        in_specs=in_specs,
        out_specs=out_specs,
        compiler_params=pltpu.CompilerParams(
            dimension_semantics=("parallel",),        # shard batch over TCs on v7x
            vmem_limit_bytes=64 * 1024 * 1024),       # explicit scoped-VMEM budget
        cost_estimate=pl.CostEstimate(flops=flops,
                                      transcendentals=transcendentals,
                                      bytes_accessed=bytes_accessed),
    )(x_nsc, *stacked_params)

    # RandomCombine (eval) returns the last layer's output; just transpose back.
    return jnp.transpose(out_nsc, (1, 0, 2))


# =============================== parameter init =================================
def init_layer_params(key, C=D_MODEL, F=DIM_FF):
    ks = jax.random.split(key, 8)
    s = 1.0 / math.sqrt(C)
    wqkv = jax.random.uniform(ks[0], (C, 3 * C), jnp.float32, -s, s)
    bqkv = jax.random.uniform(ks[1], (1, 3 * C), jnp.float32, -s, s)
    wo = jax.random.uniform(ks[2], (C, C), jnp.float32, -s, s)
    bo = jax.random.uniform(ks[3], (1, C), jnp.float32, -s, s)
    w1 = jax.random.uniform(ks[4], (C, F), jnp.float32, -s, s)
    b1 = jax.random.uniform(ks[5], (1, F), jnp.float32, -s, s)
    sf = 1.0 / math.sqrt(F)
    w2 = 0.25 * jax.random.uniform(ks[6], (F, C), jnp.float32, -sf, sf)  # initial_scale=0.25
    b2 = 0.25 * jax.random.uniform(ks[7], (1, C), jnp.float32, -sf, sf)
    return (wqkv, bqkv, wo, bo, w1, b1, w2, b2)


def stack_layer_params(layer_params):
    """List of per-layer tuples -> stacked (L, ...) arrays for the kernel.

    Folds 1/sqrt(head_dim) into the Q columns of W_qkv / b_qkv (so the kernel never
    multiplies Q by the scale) and casts the matmul weights to bf16 for the MXU.
    Biases stay f32 (added to the f32 accumulators).
    """
    wqkv, bqkv, wo, bo, w1, b1, w2, b2 = (jnp.stack(ws, 0) for ws in zip(*layer_params))
    scale = HEAD_DIM ** -0.5
    qscale = jnp.concatenate([jnp.full((D_MODEL,), scale, jnp.float32),
                              jnp.ones((2 * D_MODEL,), jnp.float32)])
    wqkv = wqkv * qscale
    bqkv = bqkv * qscale
    return (wqkv.astype(jnp.bfloat16), bqkv,
            wo.astype(jnp.bfloat16), bo,
            w1.astype(jnp.bfloat16), b1,
            w2.astype(jnp.bfloat16), b2)


# ============================ pure-JAX reference ================================
def _ref_layer(x, params):                                           # x: (N, S, C)
    wqkv, bqkv, wo, bo, w1, b1, w2, b2 = params
    N, S, C = x.shape
    qkv = x @ wqkv + bqkv[0]
    q, k, v = jnp.split(qkv, 3, axis=-1)
    q = q * (HEAD_DIM ** -0.5)
    qh = q.reshape(N, S, NHEAD, HEAD_DIM)
    kh = k.reshape(N, S, NHEAD, HEAD_DIM)
    vh = v.reshape(N, S, NHEAD, HEAD_DIM)
    scores = jnp.einsum("nqhd,nkhd->nhqk", qh, kh)
    p = jax.nn.softmax(scores, axis=-1)
    attn = jnp.einsum("nhqk,nkhd->nqhd", p, vh).reshape(N, S, C) @ wo + bo[0]
    src = x + attn
    h = src @ w1 + b1[0]
    h = h * jax.nn.sigmoid(h - 1.0)
    src = src + h @ w2 + b2[0]
    return src * jax.lax.rsqrt(jnp.mean(src * src, axis=-1, keepdims=True) + BASICNORM_EPS)


def _ref_forward(src_snc, layer_params):
    x = jnp.transpose(src_snc, (1, 0, 2))
    for params in layer_params:
        x = _ref_layer(x, params)
    return jnp.transpose(x, (1, 0, 2))


# ===================================== main =====================================
if __name__ == "__main__":
    S, N, C = 8, 2, D_MODEL
    root = jax.random.PRNGKey(0)
    k_src, k_par = jax.random.split(root)
    src = jax.random.normal(k_src, (S, N, C), jnp.float32)            # (S, N, C)

    layer_keys = jax.random.split(k_par, NUM_LAYERS)
    layer_params = [init_layer_params(k) for k in layer_keys]
    stacked_params = stack_layer_params(layer_params)

    fwd = jax.jit(transformer_encoder_forward)
    out = fwd(src, stacked_params)
    out = jax.block_until_ready(out)

    ref = _ref_forward(src, layer_params)
    assert out.shape == (S, N, C)
    # Tolerance accounts for bf16 MXU operands (f32 accumulation) and the EUP's
    # approximate reciprocal in the softmax denominator; observed error is well
    # below this bound vs. the f32 reference.
    assert jnp.allclose(out, ref, rtol=3e-2, atol=3e-2), "Pallas output mismatch vs reference"
    print("KERNEL_OK")
</pallas_src>

<mosaic_0001>
module attributes {stable_mosaic.version = 11 : i64} {
  func.func @_encoder_stack_kernel(%arg0: i32, %arg1: memref<1x8x32xf32, #tpu.memory_space<vmem>>, %arg2: memref<3x32x96xbf16, #tpu.memory_space<vmem>>, %arg3: memref<3x1x96xf32, #tpu.memory_space<vmem>>, %arg4: memref<3x32x32xbf16, #tpu.memory_space<vmem>>, %arg5: memref<3x1x32xf32, #tpu.memory_space<vmem>>, %arg6: memref<3x32x64xbf16, #tpu.memory_space<vmem>>, %arg7: memref<3x1x64xf32, #tpu.memory_space<vmem>>, %arg8: memref<3x64x32xbf16, #tpu.memory_space<vmem>>, %arg9: memref<3x1x32xf32, #tpu.memory_space<vmem>>, %arg10: memref<1x8x32xf32, #tpu.memory_space<vmem>>) attributes {dimension_semantics = [#tpu.dimension_semantics<parallel>], iteration_bounds = array<i64: 2>, scalar_prefetch = 0 : i64, scratch_operands = 0 : i64, tpu.core_type = #tpu.core_type<tc>, window_params = [{transform_indices = @transform_0, window_bounds = array<i64: 1, 8, 32>}, {pipeline_mode = #tpu.pipeline_mode<synchronous>, transform_indices = @transform_1, window_bounds = array<i64: 3, 32, 96>}, {pipeline_mode = #tpu.pipeline_mode<synchronous>, transform_indices = @transform_2, window_bounds = array<i64: 3, 1, 96>}, {pipeline_mode = #tpu.pipeline_mode<synchronous>, transform_indices = @transform_3, window_bounds = array<i64: 3, 32, 32>}, {pipeline_mode = #tpu.pipeline_mode<synchronous>, transform_indices = @transform_4, window_bounds = array<i64: 3, 1, 32>}, {pipeline_mode = #tpu.pipeline_mode<synchronous>, transform_indices = @transform_5, window_bounds = array<i64: 3, 32, 64>}, {pipeline_mode = #tpu.pipeline_mode<synchronous>, transform_indices = @transform_6, window_bounds = array<i64: 3, 1, 64>}, {pipeline_mode = #tpu.pipeline_mode<synchronous>, transform_indices = @transform_7, window_bounds = array<i64: 3, 64, 32>}, {pipeline_mode = #tpu.pipeline_mode<synchronous>, transform_indices = @transform_8, window_bounds = array<i64: 3, 1, 32>}, {transform_indices = @transform_9, window_bounds = array<i64: 1, 8, 32>}]} {
    %c0 = arith.constant 0 : index
    %c0_0 = arith.constant 0 : index
    %c0_1 = arith.constant 0 : index
    %0 = vector.load %arg1[%c0, %c0_0, %c0_1] : memref<1x8x32xf32, #tpu.memory_space<vmem>>, vector<1x8x32xf32>
    %1 = vector.shape_cast %0 : vector<1x8x32xf32> to vector<8x32xf32>
    %2 = arith.truncf %1 : vector<8x32xf32> to vector<8x32xbf16>
    %c0_2 = arith.constant 0 : index
    %c0_3 = arith.constant 0 : index
    %c0_4 = arith.constant 0 : index
    %3 = vector.load %arg2[%c0_2, %c0_3, %c0_4] : memref<3x32x96xbf16, #tpu.memory_space<vmem>>, vector<1x32x96xbf16>
    %4 = vector.shape_cast %3 : vector<1x32x96xbf16> to vector<32x96xbf16>
    %cst = arith.constant dense<0.000000e+00> : vector<8x96xf32>
    %5 = tpu.matmul %2, %4, %cst {dimension_numbers = #tpu.dot_dimension_numbers<[1], [0], [0], [1], [0, 0, 1, 1], [], []>} : vector<8x32xbf16>, vector<32x96xbf16>, vector<8x96xf32> -> vector<8x96xf32>
    %c0_5 = arith.constant 0 : index
    %c0_6 = arith.constant 0 : index
    %c0_7 = arith.constant 0 : index
    %6 = vector.load %arg3[%c0_5, %c0_6, %c0_7] : memref<3x1x96xf32, #tpu.memory_space<vmem>>, vector<1x1x96xf32>
    %7 = vector.shape_cast %6 : vector<1x1x96xf32> to vector<1x96xf32>
    %8 = vector.broadcast %7 : vector<1x96xf32> to vector<8x96xf32>
    %9 = arith.addf %5, %8 : vector<8x96xf32>
    %10 = vector.extract_strided_slice %9 {offsets = [0, 0], sizes = [8, 8], strides = [1, 1]} : vector<8x96xf32> to vector<8x8xf32>
    %11 = arith.truncf %10 : vector<8x8xf32> to vector<8x8xbf16>
    %12 = vector.extract_strided_slice %9 {offsets = [0, 32], sizes = [8, 8], strides = [1, 1]} : vector<8x96xf32> to vector<8x8xf32>
    %13 = arith.truncf %12 : vector<8x8xf32> to vector<8x8xbf16>
    %14 = vector.extract_strided_slice %9 {offsets = [0, 64], sizes = [8, 8], strides = [1, 1]} : vector<8x96xf32> to vector<8x8xf32>
    %15 = arith.truncf %14 : vector<8x8xf32> to vector<8x8xbf16>
    %cst_8 = arith.constant dense<0.000000e+00> : vector<8x8xf32>
    %16 = tpu.matmul %11, %13, %cst_8 {dimension_numbers = #tpu.dot_dimension_numbers<[1], [1], [0], [0], [0, 0, 1, 0], [], []>} : vector<8x8xbf16>, vector<8x8xbf16>, vector<8x8xf32> -> vector<8x8xf32>
    %cst_9 = arith.constant dense<0xFF800000> : vector<8xf32>
    %17 = vector.multi_reduction <maximumf>, %16, %cst_9 [1] : vector<8x8xf32> to vector<8xf32>
    %18 = vector.shape_cast %17 : vector<8xf32> to vector<8x1xf32>
    %19 = vector.broadcast %18 : vector<8x1xf32> to vector<8x8xf32>
    %20 = arith.subf %16, %19 : vector<8x8xf32>
    %21 = math.exp %20 : vector<8x8xf32>
    %cst_10 = arith.constant dense<0.000000e+00> : vector<8xf32>
    %22 = vector.multi_reduction <add>, %21, %cst_10 [1] : vector<8x8xf32> to vector<8xf32>
    %23 = vector.shape_cast %22 : vector<8xf32> to vector<8x1xf32>
    %24 = tpu.reciprocal %23 {approx = true} : vector<8x1xf32> -> vector<8x1xf32>
    %25 = vector.broadcast %24 : vector<8x1xf32> to vector<8x8xf32>
    %26 = arith.mulf %21, %25 : vector<8x8xf32>
    %27 = arith.truncf %26 : vector<8x8xf32> to vector<8x8xbf16>
    %cst_11 = arith.constant dense<0.000000e+00> : vector<8x8xf32>
    %28 = tpu.matmul %27, %15, %cst_11 {dimension_numbers = #tpu.dot_dimension_numbers<[1], [0], [0], [1], [0, 0, 1, 1], [], []>} : vector<8x8xbf16>, vector<8x8xbf16>, vector<8x8xf32> -> vector<8x8xf32>
    %29 = vector.extract_strided_slice %9 {offsets = [0, 8], sizes = [8, 8], strides = [1, 1]} : vector<8x96xf32> to vector<8x8xf32>
    %30 = arith.truncf %29 : vector<8x8xf32> to vector<8x8xbf16>
    %31 = vector.extract_strided_slice %9 {offsets = [0, 40], sizes = [8, 8], strides = [1, 1]} : vector<8x96xf32> to vector<8x8xf32>
    %32 = arith.truncf %31 : vector<8x8xf32> to vector<8x8xbf16>
    %33 = vector.extract_strided_slice %9 {offsets = [0, 72], sizes = [8, 8], strides = [1, 1]} : vector<8x96xf32> to vector<8x8xf32>
    %34 = arith.truncf %33 : vector<8x8xf32> to vector<8x8xbf16>
    %cst_12 = arith.constant dense<0.000000e+00> : vector<8x8xf32>
    %35 = tpu.matmul %30, %32, %cst_12 {dimension_numbers = #tpu.dot_dimension_numbers<[1], [1], [0], [0], [0, 0, 1, 0], [], []>} : vector<8x8xbf16>, vector<8x8xbf16>, vector<8x8xf32> -> vector<8x8xf32>
    %cst_13 = arith.constant dense<0xFF800000> : vector<8xf32>
    %36 = vector.multi_reduction <maximumf>, %35, %cst_13 [1] : vector<8x8xf32> to vector<8xf32>
    %37 = vector.shape_cast %36 : vector<8xf32> to vector<8x1xf32>
    %38 = vector.broadcast %37 : vector<8x1xf32> to vector<8x8xf32>
    %39 = arith.subf %35, %38 : vector<8x8xf32>
    %40 = math.exp %39 : vector<8x8xf32>
    %cst_14 = arith.constant dense<0.000000e+00> : vector<8xf32>
    %41 = vector.multi_reduction <add>, %40, %cst_14 [1] : vector<8x8xf32> to vector<8xf32>
    %42 = vector.shape_cast %41 : vector<8xf32> to vector<8x1xf32>
    %43 = tpu.reciprocal %42 {approx = true} : vector<8x1xf32> -> vector<8x1xf32>
    %44 = vector.broadcast %43 : vector<8x1xf32> to vector<8x8xf32>
    %45 = arith.mulf %40, %44 : vector<8x8xf32>
    %46 = arith.truncf %45 : vector<8x8xf32> to vector<8x8xbf16>
    %cst_15 = arith.constant dense<0.000000e+00> : vector<8x8xf32>
    %47 = tpu.matmul %46, %34, %cst_15 {dimension_numbers = #tpu.dot_dimension_numbers<[1], [0], [0], [1], [0, 0, 1, 1], [], []>} : vector<8x8xbf16>, vector<8x8xbf16>, vector<8x8xf32> -> vector<8x8xf32>
    %48 = vector.extract_strided_slice %9 {offsets = [0, 16], sizes = [8, 8], strides = [1, 1]} : vector<8x96xf32> to vector<8x8xf32>
    %49 = arith.truncf %48 : vector<8x8xf32> to vector<8x8xbf16>
    %50 = vector.extract_strided_slice %9 {offsets = [0, 48], sizes = [8, 8], strides = [1, 1]} : vector<8x96xf32> to vector<8x8xf32>
    %51 = arith.truncf %50 : vector<8x8xf32> to vector<8x8xbf16>
    %52 = vector.extract_strided_slice %9 {offsets = [0, 80], sizes = [8, 8], strides = [1, 1]} : vector<8x96xf32> to vector<8x8xf32>
    %53 = arith.truncf %52 : vector<8x8xf32> to vector<8x8xbf16>
    %cst_16 = arith.constant dense<0.000000e+00> : vector<8x8xf32>
    %54 = tpu.matmul %49, %51, %cst_16 {dimension_numbers = #tpu.dot_dimension_numbers<[1], [1], [0], [0], [0, 0, 1, 0], [], []>} : vector<8x8xbf16>, vector<8x8xbf16>, vector<8x8xf32> -> vector<8x8xf32>
    %cst_17 = arith.constant dense<0xFF800000> : vector<8xf32>
    %55 = vector.multi_reduction <maximumf>, %54, %cst_17 [1] : vector<8x8xf32> to vector<8xf32>
    %56 = vector.shape_cast %55 : vector<8xf32> to vector<8x1xf32>
    %57 = vector.broadcast %56 : vector<8x1xf32> to vector<8x8xf32>
    %58 = arith.subf %54, %57 : vector<8x8xf32>
    %59 = math.exp %58 : vector<8x8xf32>
    %cst_18 = arith.constant dense<0.000000e+00> : vector<8xf32>
    %60 = vector.multi_reduction <add>, %59, %cst_18 [1] : vector<8x8xf32> to vector<8xf32>
    %61 = vector.shape_cast %60 : vector<8xf32> to vector<8x1xf32>
    %62 = tpu.reciprocal %61 {approx = true} : vector<8x1xf32> -> vector<8x1xf32>
    %63 = vector.broadcast %62 : vector<8x1xf32> to vector<8x8xf32>
    %64 = arith.mulf %59, %63 : vector<8x8xf32>
    %65 = arith.truncf %64 : vector<8x8xf32> to vector<8x8xbf16>
    %cst_19 = arith.constant dense<0.000000e+00> : vector<8x8xf32>
    %66 = tpu.matmul %65, %53, %cst_19 {dimension_numbers = #tpu.dot_dimension_numbers<[1], [0], [0], [1], [0, 0, 1, 1], [], []>} : vector<8x8xbf16>, vector<8x8xbf16>, vector<8x8xf32> -> vector<8x8xf32>
    %67 = vector.extract_strided_slice %9 {offsets = [0, 24], sizes = [8, 8], strides = [1, 1]} : vector<8x96xf32> to vector<8x8xf32>
    %68 = arith.truncf %67 : vector<8x8xf32> to vector<8x8xbf16>
    %69 = vector.extract_strided_slice %9 {offsets = [0, 56], sizes = [8, 8], strides = [1, 1]} : vector<8x96xf32> to vector<8x8xf32>
    %70 = arith.truncf %69 : vector<8x8xf32> to vector<8x8xbf16>
    %71 = vector.extract_strided_slice %9 {offsets = [0, 88], sizes = [8, 8], strides = [1, 1]} : vector<8x96xf32> to vector<8x8xf32>
    %72 = arith.truncf %71 : vector<8x8xf32> to vector<8x8xbf16>
    %cst_20 = arith.constant dense<0.000000e+00> : vector<8x8xf32>
    %73 = tpu.matmul %68, %70, %cst_20 {dimension_numbers = #tpu.dot_dimension_numbers<[1], [1], [0], [0], [0, 0, 1, 0], [], []>} : vector<8x8xbf16>, vector<8x8xbf16>, vector<8x8xf32> -> vector<8x8xf32>
    %cst_21 = arith.constant dense<0xFF800000> : vector<8xf32>
    %74 = vector.multi_reduction <maximumf>, %73, %cst_21 [1] : vector<8x8xf32> to vector<8xf32>
    %75 = vector.shape_cast %74 : vector<8xf32> to vector<8x1xf32>
    %76 = vector.broadcast %75 : vector<8x1xf32> to vector<8x8xf32>
    %77 = arith.subf %73, %76 : vector<8x8xf32>
    %78 = math.exp %77 : vector<8x8xf32>
    %cst_22 = arith.constant dense<0.000000e+00> : vector<8xf32>
    %79 = vector.multi_reduction <add>, %78, %cst_22 [1] : vector<8x8xf32> to vector<8xf32>
    %80 = vector.shape_cast %79 : vector<8xf32> to vector<8x1xf32>
    %81 = tpu.reciprocal %80 {approx = true} : vector<8x1xf32> -> vector<8x1xf32>
    %82 = vector.broadcast %81 : vector<8x1xf32> to vector<8x8xf32>
    %83 = arith.mulf %78, %82 : vector<8x8xf32>
    %84 = arith.truncf %83 : vector<8x8xf32> to vector<8x8xbf16>
    %cst_23 = arith.constant dense<0.000000e+00> : vector<8x8xf32>
    %85 = tpu.matmul %84, %72, %cst_23 {dimension_numbers = #tpu.dot_dimension_numbers<[1], [0], [0], [1], [0, 0, 1, 1], [], []>} : vector<8x8xbf16>, vector<8x8xbf16>, vector<8x8xf32> -> vector<8x8xf32>
    %86 = tpu.concatenate %28, %47, %66, %85 in 1 : vector<8x8xf32>, vector<8x8xf32>, vector<8x8xf32>, vector<8x8xf32> -> vector<8x32xf32>
    %87 = arith.truncf %86 : vector<8x32xf32> to vector<8x32xbf16>
    %c0_24 = arith.constant 0 : index
    %c0_25 = arith.constant 0 : index
    %c0_26 = arith.constant 0 : index
    %88 = vector.load %arg4[%c0_24, %c0_25, %c0_26] : memref<3x32x32xbf16, #tpu.memory_space<vmem>>, vector<1x32x32xbf16>
    %89 = vector.shape_cast %88 : vector<1x32x32xbf16> to vector<32x32xbf16>
    %cst_27 = arith.constant dense<0.000000e+00> : vector<8x32xf32>
    %90 = tpu.matmul %87, %89, %cst_27 {dimension_numbers = #tpu.dot_dimension_numbers<[1], [0], [0], [1], [0, 0, 1, 1], [], []>} : vector<8x32xbf16>, vector<32x32xbf16>, vector<8x32xf32> -> vector<8x32xf32>
    %c0_28 = arith.constant 0 : index
    %c0_29 = arith.constant 0 : index
    %c0_30 = arith.constant 0 : index
    %91 = vector.load %arg5[%c0_28, %c0_29, %c0_30] : memref<3x1x32xf32, #tpu.memory_space<vmem>>, vector<1x1x32xf32>
    %92 = vector.shape_cast %91 : vector<1x1x32xf32> to vector<1x32xf32>
    %93 = vector.broadcast %92 : vector<1x32xf32> to vector<8x32xf32>
    %94 = arith.addf %90, %93 : vector<8x32xf32>
    %95 = arith.addf %1, %94 : vector<8x32xf32>
    %96 = arith.truncf %95 : vector<8x32xf32> to vector<8x32xbf16>
    %c0_31 = arith.constant 0 : index
    %c0_32 = arith.constant 0 : index
    %c0_33 = arith.constant 0 : index
    %97 = vector.load %arg6[%c0_31, %c0_32, %c0_33] : memref<3x32x64xbf16, #tpu.memory_space<vmem>>, vector<1x32x64xbf16>
    %98 = vector.shape_cast %97 : vector<1x32x64xbf16> to vector<32x64xbf16>
    %cst_34 = arith.constant dense<0.000000e+00> : vector<8x64xf32>
    %99 = tpu.matmul %96, %98, %cst_34 {dimension_numbers = #tpu.dot_dimension_numbers<[1], [0], [0], [1], [0, 0, 1, 1], [], []>} : vector<8x32xbf16>, vector<32x64xbf16>, vector<8x64xf32> -> vector<8x64xf32>
    %c0_35 = arith.constant 0 : index
    %c0_36 = arith.constant 0 : index
    %c0_37 = arith.constant 0 : index
    %100 = vector.load %arg7[%c0_35, %c0_36, %c0_37] : memref<3x1x64xf32, #tpu.memory_space<vmem>>, vector<1x1x64xf32>
    %101 = vector.shape_cast %100 : vector<1x1x64xf32> to vector<1x64xf32>
    %102 = vector.broadcast %101 : vector<1x64xf32> to vector<8x64xf32>
    %103 = arith.addf %99, %102 : vector<8x64xf32>
    %cst_38 = arith.constant 1.000000e+00 : f32
    %104 = vector.broadcast %cst_38 : f32 to vector<8x64xf32>
    %105 = arith.subf %103, %104 : vector<8x64xf32>
    %106 = arith.negf %105 : vector<8x64xf32>
    %107 = math.exp %106 : vector<8x64xf32>
    %cst_39 = arith.constant 1.000000e+00 : f32
    %108 = vector.broadcast %cst_39 : f32 to vector<8x64xf32>
    %109 = arith.addf %108, %107 : vector<8x64xf32>
    %110 = arith.divf %108, %109 : vector<8x64xf32>
    %111 = arith.mulf %103, %110 : vector<8x64xf32>
    %112 = arith.truncf %111 : vector<8x64xf32> to vector<8x64xbf16>
    %c0_40 = arith.constant 0 : index
    %c0_41 = arith.constant 0 : index
    %c0_42 = arith.constant 0 : index
    %113 = vector.load %arg8[%c0_40, %c0_41, %c0_42] : memref<3x64x32xbf16, #tpu.memory_space<vmem>>, vector<1x64x32xbf16>
    %114 = vector.shape_cast %113 : vector<1x64x32xbf16> to vector<64x32xbf16>
    %cst_43 = arith.constant dense<0.000000e+00> : vector<8x32xf32>
    %115 = tpu.matmul %112, %114, %cst_43 {dimension_numbers = #tpu.dot_dimension_numbers<[1], [0], [0], [1], [0, 0, 1, 1], [], []>} : vector<8x64xbf16>, vector<64x32xbf16>, vector<8x32xf32> -> vector<8x32xf32>
    %c0_44 = arith.constant 0 : index
    %c0_45 = arith.constant 0 : index
    %c0_46 = arith.constant 0 : index
    %116 = vector.load %arg9[%c0_44, %c0_45, %c0_46] : memref<3x1x32xf32, #tpu.memory_space<vmem>>, vector<1x1x32xf32>
    %117 = vector.shape_cast %116 : vector<1x1x32xf32> to vector<1x32xf32>
    %118 = vector.broadcast %117 : vector<1x32xf32> to vector<8x32xf32>
    %119 = arith.addf %115, %118 : vector<8x32xf32>
    %120 = arith.addf %95, %119 : vector<8x32xf32>
    %121 = arith.mulf %120, %120 : vector<8x32xf32>
    %cst_47 = arith.constant dense<0.000000e+00> : vector<8xf32>
    %122 = vector.multi_reduction <add>, %121, %cst_47 [1] : vector<8x32xf32> to vector<8xf32>
    %123 = vector.shape_cast %122 : vector<8xf32> to vector<8x1xf32>
    %cst_48 = arith.constant 3.200000e+01 : f32
    %124 = vector.broadcast %cst_48 : f32 to vector<8x1xf32>
    %125 = arith.divf %123, %124 : vector<8x1xf32>
    %cst_49 = arith.constant 2.500000e-01 : f32
    %126 = vector.broadcast %cst_49 : f32 to vector<8x1xf32>
    %127 = arith.addf %125, %126 : vector<8x1xf32>
    %128 = math.rsqrt %127 : vector<8x1xf32>
    %129 = vector.broadcast %128 : vector<8x1xf32> to vector<8x32xf32>
    %130 = arith.mulf %120, %129 : vector<8x32xf32>
    %131 = arith.truncf %130 : vector<8x32xf32> to vector<8x32xbf16>
    %c1 = arith.constant 1 : index
    %c0_50 = arith.constant 0 : index
    %c0_51 = arith.constant 0 : index
    %132 = vector.load %arg2[%c1, %c0_50, %c0_51] : memref<3x32x96xbf16, #tpu.memory_space<vmem>>, vector<1x32x96xbf16>
    %133 = vector.shape_cast %132 : vector<1x32x96xbf16> to vector<32x96xbf16>
    %cst_52 = arith.constant dense<0.000000e+00> : vector<8x96xf32>
    %134 = tpu.matmul %131, %133, %cst_52 {dimension_numbers = #tpu.dot_dimension_numbers<[1], [0], [0], [1], [0, 0, 1, 1], [], []>} : vector<8x32xbf16>, vector<32x96xbf16>, vector<8x96xf32> -> vector<8x96xf32>
    %c1_53 = arith.constant 1 : index
    %c0_54 = arith.constant 0 : index
    %c0_55 = arith.constant 0 : index
    %135 = vector.load %arg3[%c1_53, %c0_54, %c0_55] : memref<3x1x96xf32, #tpu.memory_space<vmem>>, vector<1x1x96xf32>
    %136 = vector.shape_cast %135 : vector<1x1x96xf32> to vector<1x96xf32>
    %137 = vector.broadcast %136 : vector<1x96xf32> to vector<8x96xf32>
    %138 = arith.addf %134, %137 : vector<8x96xf32>
    %139 = vector.extract_strided_slice %138 {offsets = [0, 0], sizes = [8, 8], strides = [1, 1]} : vector<8x96xf32> to vector<8x8xf32>
    %140 = arith.truncf %139 : vector<8x8xf32> to vector<8x8xbf16>
    %141 = vector.extract_strided_slice %138 {offsets = [0, 32], sizes = [8, 8], strides = [1, 1]} : vector<8x96xf32> to vector<8x8xf32>
    %142 = arith.truncf %141 : vector<8x8xf32> to vector<8x8xbf16>
    %143 = vector.extract_strided_slice %138 {offsets = [0, 64], sizes = [8, 8], strides = [1, 1]} : vector<8x96xf32> to vector<8x8xf32>
    %144 = arith.truncf %143 : vector<8x8xf32> to vector<8x8xbf16>
    %cst_56 = arith.constant dense<0.000000e+00> : vector<8x8xf32>
    %145 = tpu.matmul %140, %142, %cst_56 {dimension_numbers = #tpu.dot_dimension_numbers<[1], [1], [0], [0], [0, 0, 1, 0], [], []>} : vector<8x8xbf16>, vector<8x8xbf16>, vector<8x8xf32> -> vector<8x8xf32>
    %cst_57 = arith.constant dense<0xFF800000> : vector<8xf32>
    %146 = vector.multi_reduction <maximumf>, %145, %cst_57 [1] : vector<8x8xf32> to vector<8xf32>
    %147 = vector.shape_cast %146 : vector<8xf32> to vector<8x1xf32>
    %148 = vector.broadcast %147 : vector<8x1xf32> to vector<8x8xf32>
    %149 = arith.subf %145, %148 : vector<8x8xf32>
    %150 = math.exp %149 : vector<8x8xf32>
    %cst_58 = arith.constant dense<0.000000e+00> : vector<8xf32>
    %151 = vector.multi_reduction <add>, %150, %cst_58 [1] : vector<8x8xf32> to vector<8xf32>
    %152 = vector.shape_cast %151 : vector<8xf32> to vector<8x1xf32>
    %153 = tpu.reciprocal %152 {approx = true} : vector<8x1xf32> -> vector<8x1xf32>
    %154 = vector.broadcast %153 : vector<8x1xf32> to vector<8x8xf32>
    %155 = arith.mulf %150, %154 : vector<8x8xf32>
    %156 = arith.truncf %155 : vector<8x8xf32> to vector<8x8xbf16>
    %cst_59 = arith.constant dense<0.000000e+00> : vector<8x8xf32>
    %157 = tpu.matmul %156, %144, %cst_59 {dimension_numbers = #tpu.dot_dimension_numbers<[1], [0], [0], [1], [0, 0, 1, 1], [], []>} : vector<8x8xbf16>, vector<8x8xbf16>, vector<8x8xf32> -> vector<8x8xf32>
    %158 = vector.extract_strided_slice %138 {offsets = [0, 8], sizes = [8, 8], strides = [1, 1]} : vector<8x96xf32> to vector<8x8xf32>
    %159 = arith.truncf %158 : vector<8x8xf32> to vector<8x8xbf16>
    %160 = vector.extract_strided_slice %138 {offsets = [0, 40], sizes = [8, 8], strides = [1, 1]} : vector<8x96xf32> to vector<8x8xf32>
    %161 = arith.truncf %160 : vector<8x8xf32> to vector<8x8xbf16>
    %162 = vector.extract_strided_slice %138 {offsets = [0, 72], sizes = [8, 8], strides = [1, 1]} : vector<8x96xf32> to vector<8x8xf32>
    %163 = arith.truncf %162 : vector<8x8xf32> to vector<8x8xbf16>
    %cst_60 = arith.constant dense<0.000000e+00> : vector<8x8xf32>
    %164 = tpu.matmul %159, %161, %cst_60 {dimension_numbers = #tpu.dot_dimension_numbers<[1], [1], [0], [0], [0, 0, 1, 0], [], []>} : vector<8x8xbf16>, vector<8x8xbf16>, vector<8x8xf32> -> vector<8x8xf32>
    %cst_61 = arith.constant dense<0xFF800000> : vector<8xf32>
    %165 = vector.multi_reduction <maximumf>, %164, %cst_61 [1] : vector<8x8xf32> to vector<8xf32>
    %166 = vector.shape_cast %165 : vector<8xf32> to vector<8x1xf32>
    %167 = vector.broadcast %166 : vector<8x1xf32> to vector<8x8xf32>
    %168 = arith.subf %164, %167 : vector<8x8xf32>
    %169 = math.exp %168 : vector<8x8xf32>
    %cst_62 = arith.constant dense<0.000000e+00> : vector<8xf32>
    %170 = vector.multi_reduction <add>, %169, %cst_62 [1] : vector<8x8xf32> to vector<8xf32>
    %171 = vector.shape_cast %170 : vector<8xf32> to vector<8x1xf32>
    %172 = tpu.reciprocal %171 {approx = true} : vector<8x1xf32> -> vector<8x1xf32>
    %173 = vector.broadcast %172 : vector<8x1xf32> to vector<8x8xf32>
    %174 = arith.mulf %169, %173 : vector<8x8xf32>
    %175 = arith.truncf %174 : vector<8x8xf32> to vector<8x8xbf16>
    %cst_63 = arith.constant dense<0.000000e+00> : vector<8x8xf32>
    %176 = tpu.matmul %175, %163, %cst_63 {dimension_numbers = #tpu.dot_dimension_numbers<[1], [0], [0], [1], [0, 0, 1, 1], [], []>} : vector<8x8xbf16>, vector<8x8xbf16>, vector<8x8xf32> -> vector<8x8xf32>
    %177 = vector.extract_strided_slice %138 {offsets = [0, 16], sizes = [8, 8], strides = [1, 1]} : vector<8x96xf32> to vector<8x8xf32>
    %178 = arith.truncf %177 : vector<8x8xf32> to vector<8x8xbf16>
    %179 = vector.extract_strided_slice %138 {offsets = [0, 48], sizes = [8, 8], strides = [1, 1]} : vector<8x96xf32> to vector<8x8xf32>
    %180 = arith.truncf %179 : vector<8x8xf32> to vector<8x8xbf16>
    %181 = vector.extract_strided_slice %138 {offsets = [0, 80], sizes = [8, 8], strides = [1, 1]} : vector<8x96xf32> to vector<8x8xf32>
    %182 = arith.truncf %181 : vector<8x8xf32> to vector<8x8xbf16>
    %cst_64 = arith.constant dense<0.000000e+00> : vector<8x8xf32>
    %183 = tpu.matmul %178, %180, %cst_64 {dimension_numbers = #tpu.dot_dimension_numbers<[1], [1], [0], [0], [0, 0, 1, 0], [], []>} : vector<8x8xbf16>, vector<8x8xbf16>, vector<8x8xf32> -> vector<8x8xf32>
    %cst_65 = arith.constant dense<0xFF800000> : vector<8xf32>
    %184 = vector.multi_reduction <maximumf>, %183, %cst_65 [1] : vector<8x8xf32> to vector<8xf32>
    %185 = vector.shape_cast %184 : vector<8xf32> to vector<8x1xf32>
    %186 = vector.broadcast %185 : vector<8x1xf32> to vector<8x8xf32>
    %187 = arith.subf %183, %186 : vector<8x8xf32>
    %188 = math.exp %187 : vector<8x8xf32>
    %cst_66 = arith.constant dense<0.000000e+00> : vector<8xf32>
    %189 = vector.multi_reduction <add>, %188, %cst_66 [1] : vector<8x8xf32> to vector<8xf32>
    %190 = vector.shape_cast %189 : vector<8xf32> to vector<8x1xf32>
    %191 = tpu.reciprocal %190 {approx = true} : vector<8x1xf32> -> vector<8x1xf32>
    %192 = vector.broadcast %191 : vector<8x1xf32> to vector<8x8xf32>
    %193 = arith.mulf %188, %192 : vector<8x8xf32>
    %194 = arith.truncf %193 : vector<8x8xf32> to vector<8x8xbf16>
    %cst_67 = arith.constant dense<0.000000e+00> : vector<8x8xf32>
    %195 = tpu.matmul %194, %182, %cst_67 {dimension_numbers = #tpu.dot_dimension_numbers<[1], [0], [0], [1], [0, 0, 1, 1], [], []>} : vector<8x8xbf16>, vector<8x8xbf16>, vector<8x8xf32> -> vector<8x8xf32>
    %196 = vector.extract_strided_slice %138 {offsets = [0, 24], sizes = [8, 8], strides = [1, 1]} : vector<8x96xf32> to vector<8x8xf32>
    %197 = arith.truncf %196 : vector<8x8xf32> to vector<8x8xbf16>
    %198 = vector.extract_strided_slice %138 {offsets = [0, 56], sizes = [8, 8], strides = [1, 1]} : vector<8x96xf32> to vector<8x8xf32>
    %199 = arith.truncf %198 : vector<8x8xf32> to vector<8x8xbf16>
    %200 = vector.extract_strided_slice %138 {offsets = [0, 88], sizes = [8, 8], strides = [1, 1]} : vector<8x96xf32> to vector<8x8xf32>
    %201 = arith.truncf %200 : vector<8x8xf32> to vector<8x8xbf16>
    %cst_68 = arith.constant dense<0.000000e+00> : vector<8x8xf32>
    %202 = tpu.matmul %197, %199, %cst_68 {dimension_numbers = #tpu.dot_dimension_numbers<[1], [1], [0], [0], [0, 0, 1, 0], [], []>} : vector<8x8xbf16>, vector<8x8xbf16>, vector<8x8xf32> -> vector<8x8xf32>
    %cst_69 = arith.constant dense<0xFF800000> : vector<8xf32>
    %203 = vector.multi_reduction <maximumf>, %202, %cst_69 [1] : vector<8x8xf32> to vector<8xf32>
    %204 = vector.shape_cast %203 : vector<8xf32> to vector<8x1xf32>
    %205 = vector.broadcast %204 : vector<8x1xf32> to vector<8x8xf32>
    %206 = arith.subf %202, %205 : vector<8x8xf32>
    %207 = math.exp %206 : vector<8x8xf32>
    %cst_70 = arith.constant dense<0.000000e+00> : vector<8xf32>
    %208 = vector.multi_reduction <add>, %207, %cst_70 [1] : vector<8x8xf32> to vector<8xf32>
    %209 = vector.shape_cast %208 : vector<8xf32> to vector<8x1xf32>
    %210 = tpu.reciprocal %209 {approx = true} : vector<8x1xf32> -> vector<8x1xf32>
    %211 = vector.broadcast %210 : vector<8x1xf32> to vector<8x8xf32>
    %212 = arith.mulf %207, %211 : vector<8x8xf32>
    %213 = arith.truncf %212 : vector<8x8xf32> to vector<8x8xbf16>
    %cst_71 = arith.constant dense<0.000000e+00> : vector<8x8xf32>
    %214 = tpu.matmul %213, %201, %cst_71 {dimension_numbers = #tpu.dot_dimension_numbers<[1], [0], [0], [1], [0, 0, 1, 1], [], []>} : vector<8x8xbf16>, vector<8x8xbf16>, vector<8x8xf32> -> vector<8x8xf32>
    %215 = tpu.concatenate %157, %176, %195, %214 in 1 : vector<8x8xf32>, vector<8x8xf32>, vector<8x8xf32>, vector<8x8xf32> -> vector<8x32xf32>
    %216 = arith.truncf %215 : vector<8x32xf32> to vector<8x32xbf16>
    %c1_72 = arith.constant 1 : index
    %c0_73 = arith.constant 0 : index
    %c0_74 = arith.constant 0 : index
    %217 = vector.load %arg4[%c1_72, %c0_73, %c0_74] : memref<3x32x32xbf16, #tpu.memory_space<vmem>>, vector<1x32x32xbf16>
    %218 = vector.shape_cast %217 : vector<1x32x32xbf16> to vector<32x32xbf16>
    %cst_75 = arith.constant dense<0.000000e+00> : vector<8x32xf32>
    %219 = tpu.matmul %216, %218, %cst_75 {dimension_numbers = #tpu.dot_dimension_numbers<[1], [0], [0], [1], [0, 0, 1, 1], [], []>} : vector<8x32xbf16>, vector<32x32xbf16>, vector<8x32xf32> -> vector<8x32xf32>
    %c1_76 = arith.constant 1 : index
    %c0_77 = arith.constant 0 : index
    %c0_78 = arith.constant 0 : index
    %220 = vector.load %arg5[%c1_76, %c0_77, %c0_78] : memref<3x1x32xf32, #tpu.memory_space<vmem>>, vector<1x1x32xf32>
    %221 = vector.shape_cast %220 : vector<1x1x32xf32> to vector<1x32xf32>
    %222 = vector.broadcast %221 : vector<1x32xf32> to vector<8x32xf32>
    %223 = arith.addf %219, %222 : vector<8x32xf32>
    %224 = arith.addf %130, %223 : vector<8x32xf32>
    %225 = arith.truncf %224 : vector<8x32xf32> to vector<8x32xbf16>
    %c1_79 = arith.constant 1 : index
    %c0_80 = arith.constant 0 : index
    %c0_81 = arith.constant 0 : index
    %226 = vector.load %arg6[%c1_79, %c0_80, %c0_81] : memref<3x32x64xbf16, #tpu.memory_space<vmem>>, vector<1x32x64xbf16>
    %227 = vector.shape_cast %226 : vector<1x32x64xbf16> to vector<32x64xbf16>
    %cst_82 = arith.constant dense<0.000000e+00> : vector<8x64xf32>
    %228 = tpu.matmul %225, %227, %cst_82 {dimension_numbers = #tpu.dot_dimension_numbers<[1], [0], [0], [1], [0, 0, 1, 1], [], []>} : vector<8x32xbf16>, vector<32x64xbf16>, vector<8x64xf32> -> vector<8x64xf32>
    %c1_83 = arith.constant 1 : index
    %c0_84 = arith.constant 0 : index
    %c0_85 = arith.constant 0 : index
    %229 = vector.load %arg7[%c1_83, %c0_84, %c0_85] : memref<3x1x64xf32, #tpu.memory_space<vmem>>, vector<1x1x64xf32>
    %230 = vector.shape_cast %229 : vector<1x1x64xf32> to vector<1x64xf32>
    %231 = vector.broadcast %230 : vector<1x64xf32> to vector<8x64xf32>
    %232 = arith.addf %228, %231 : vector<8x64xf32>
    %cst_86 = arith.constant 1.000000e+00 : f32
    %233 = vector.broadcast %cst_86 : f32 to vector<8x64xf32>
    %234 = arith.subf %232, %233 : vector<8x64xf32>
    %235 = arith.negf %234 : vector<8x64xf32>
    %236 = math.exp %235 : vector<8x64xf32>
    %cst_87 = arith.constant 1.000000e+00 : f32
    %237 = vector.broadcast %cst_87 : f32 to vector<8x64xf32>
    %238 = arith.addf %237, %236 : vector<8x64xf32>
    %239 = arith.divf %237, %238 : vector<8x64xf32>
    %240 = arith.mulf %232, %239 : vector<8x64xf32>
    %241 = arith.truncf %240 : vector<8x64xf32> to vector<8x64xbf16>
    %c1_88 = arith.constant 1 : index
    %c0_89 = arith.constant 0 : index
    %c0_90 = arith.constant 0 : index
    %242 = vector.load %arg8[%c1_88, %c0_89, %c0_90] : memref<3x64x32xbf16, #tpu.memory_space<vmem>>, vector<1x64x32xbf16>
    %243 = vector.shape_cast %242 : vector<1x64x32xbf16> to vector<64x32xbf16>
    %cst_91 = arith.constant dense<0.000000e+00> : vector<8x32xf32>
    %244 = tpu.matmul %241, %243, %cst_91 {dimension_numbers = #tpu.dot_dimension_numbers<[1], [0], [0], [1], [0, 0, 1, 1], [], []>} : vector<8x64xbf16>, vector<64x32xbf16>, vector<8x32xf32> -> vector<8x32xf32>
    %c1_92 = arith.constant 1 : index
    %c0_93 = arith.constant 0 : index
    %c0_94 = arith.constant 0 : index
    %245 = vector.load %arg9[%c1_92, %c0_93, %c0_94] : memref<3x1x32xf32, #tpu.memory_space<vmem>>, vector<1x1x32xf32>
    %246 = vector.shape_cast %245 : vector<1x1x32xf32> to vector<1x32xf32>
    %247 = vector.broadcast %246 : vector<1x32xf32> to vector<8x32xf32>
    %248 = arith.addf %244, %247 : vector<8x32xf32>
    %249 = arith.addf %224, %248 : vector<8x32xf32>
    %250 = arith.mulf %249, %249 : vector<8x32xf32>
    %cst_95 = arith.constant dense<0.000000e+00> : vector<8xf32>
    %251 = vector.multi_reduction <add>, %250, %cst_95 [1] : vector<8x32xf32> to vector<8xf32>
    %252 = vector.shape_cast %251 : vector<8xf32> to vector<8x1xf32>
    %cst_96 = arith.constant 3.200000e+01 : f32
    %253 = vector.broadcast %cst_96 : f32 to vector<8x1xf32>
    %254 = arith.divf %252, %253 : vector<8x1xf32>
    %cst_97 = arith.constant 2.500000e-01 : f32
    %255 = vector.broadcast %cst_97 : f32 to vector<8x1xf32>
    %256 = arith.addf %254, %255 : vector<8x1xf32>
    %257 = math.rsqrt %256 : vector<8x1xf32>
    %258 = vector.broadcast %257 : vector<8x1xf32> to vector<8x32xf32>
    %259 = arith.mulf %249, %258 : vector<8x32xf32>
    %260 = arith.truncf %259 : vector<8x32xf32> to vector<8x32xbf16>
    %c2 = arith.constant 2 : index
    %c0_98 = arith.constant 0 : index
    %c0_99 = arith.constant 0 : index
    %261 = vector.load %arg2[%c2, %c0_98, %c0_99] : memref<3x32x96xbf16, #tpu.memory_space<vmem>>, vector<1x32x96xbf16>
    %262 = vector.shape_cast %261 : vector<1x32x96xbf16> to vector<32x96xbf16>
    %cst_100 = arith.constant dense<0.000000e+00> : vector<8x96xf32>
    %263 = tpu.matmul %260, %262, %cst_100 {dimension_numbers = #tpu.dot_dimension_numbers<[1], [0], [0], [1], [0, 0, 1, 1], [], []>} : vector<8x32xbf16>, vector<32x96xbf16>, vector<8x96xf32> -> vector<8x96xf32>
    %c2_101 = arith.constant 2 : index
    %c0_102 = arith.constant 0 : index
    %c0_103 = arith.constant 0 : index
    %264 = vector.load %arg3[%c2_101, %c0_102, %c0_103] : memref<3x1x96xf32, #tpu.memory_space<vmem>>, vector<1x1x96xf32>
    %265 = vector.shape_cast %264 : vector<1x1x96xf32> to vector<1x96xf32>
    %266 = vector.broadcast %265 : vector<1x96xf32> to vector<8x96xf32>
    %267 = arith.addf %263, %266 : vector<8x96xf32>
    %268 = vector.extract_strided_slice %267 {offsets = [0, 0], sizes = [8, 8], strides = [1, 1]} : vector<8x96xf32> to vector<8x8xf32>
    %269 = arith.truncf %268 : vector<8x8xf32> to vector<8x8xbf16>
    %270 = vector.extract_strided_slice %267 {offsets = [0, 32], sizes = [8, 8], strides = [1, 1]} : vector<8x96xf32> to vector<8x8xf32>
    %271 = arith.truncf %270 : vector<8x8xf32> to vector<8x8xbf16>
    %272 = vector.extract_strided_slice %267 {offsets = [0, 64], sizes = [8, 8], strides = [1, 1]} : vector<8x96xf32> to vector<8x8xf32>
    %273 = arith.truncf %272 : vector<8x8xf32> to vector<8x8xbf16>
    %cst_104 = arith.constant dense<0.000000e+00> : vector<8x8xf32>
    %274 = tpu.matmul %269, %271, %cst_104 {dimension_numbers = #tpu.dot_dimension_numbers<[1], [1], [0], [0], [0, 0, 1, 0], [], []>} : vector<8x8xbf16>, vector<8x8xbf16>, vector<8x8xf32> -> vector<8x8xf32>
    %cst_105 = arith.constant dense<0xFF800000> : vector<8xf32>
    %275 = vector.multi_reduction <maximumf>, %274, %cst_105 [1] : vector<8x8xf32> to vector<8xf32>
    %276 = vector.shape_cast %275 : vector<8xf32> to vector<8x1xf32>
    %277 = vector.broadcast %276 : vector<8x1xf32> to vector<8x8xf32>
    %278 = arith.subf %274, %277 : vector<8x8xf32>
    %279 = math.exp %278 : vector<8x8xf32>
    %cst_106 = arith.constant dense<0.000000e+00> : vector<8xf32>
    %280 = vector.multi_reduction <add>, %279, %cst_106 [1] : vector<8x8xf32> to vector<8xf32>
    %281 = vector.shape_cast %280 : vector<8xf32> to vector<8x1xf32>
    %282 = tpu.reciprocal %281 {approx = true} : vector<8x1xf32> -> vector<8x1xf32>
    %283 = vector.broadcast %282 : vector<8x1xf32> to vector<8x8xf32>
    %284 = arith.mulf %279, %283 : vector<8x8xf32>
    %285 = arith.truncf %284 : vector<8x8xf32> to vector<8x8xbf16>
    %cst_107 = arith.constant dense<0.000000e+00> : vector<8x8xf32>
    %286 = tpu.matmul %285, %273, %cst_107 {dimension_numbers = #tpu.dot_dimension_numbers<[1], [0], [0], [1], [0, 0, 1, 1], [], []>} : vector<8x8xbf16>, vector<8x8xbf16>, vector<8x8xf32> -> vector<8x8xf32>
    %287 = vector.extract_strided_slice %267 {offsets = [0, 8], sizes = [8, 8], strides = [1, 1]} : vector<8x96xf32> to vector<8x8xf32>
    %288 = arith.truncf %287 : vector<8x8xf32> to vector<8x8xbf16>
    %289 = vector.extract_strided_slice %267 {offsets = [0, 40], sizes = [8, 8], strides = [1, 1]} : vector<8x96xf32> to vector<8x8xf32>
    %290 = arith.truncf %289 : vector<8x8xf32> to vector<8x8xbf16>
    %291 = vector.extract_strided_slice %267 {offsets = [0, 72], sizes = [8, 8], strides = [1, 1]} : vector<8x96xf32> to vector<8x8xf32>
    %292 = arith.truncf %291 : vector<8x8xf32> to vector<8x8xbf16>
    %cst_108 = arith.constant dense<0.000000e+00> : vector<8x8xf32>
    %293 = tpu.matmul %288, %290, %cst_108 {dimension_numbers = #tpu.dot_dimension_numbers<[1], [1], [0], [0], [0, 0, 1, 0], [], []>} : vector<8x8xbf16>, vector<8x8xbf16>, vector<8x8xf32> -> vector<8x8xf32>
    %cst_109 = arith.constant dense<0xFF800000> : vector<8xf32>
    %294 = vector.multi_reduction <maximumf>, %293, %cst_109 [1] : vector<8x8xf32> to vector<8xf32>
    %295 = vector.shape_cast %294 : vector<8xf32> to vector<8x1xf32>
    %296 = vector.broadcast %295 : vector<8x1xf32> to vector<8x8xf32>
    %297 = arith.subf %293, %296 : vector<8x8xf32>
    %298 = math.exp %297 : vector<8x8xf32>
    %cst_110 = arith.constant dense<0.000000e+00> : vector<8xf32>
    %299 = vector.multi_reduction <add>, %298, %cst_110 [1] : vector<8x8xf32> to vector<8xf32>
    %300 = vector.shape_cast %299 : vector<8xf32> to vector<8x1xf32>
    %301 = tpu.reciprocal %300 {approx = true} : vector<8x1xf32> -> vector<8x1xf32>
    %302 = vector.broadcast %301 : vector<8x1xf32> to vector<8x8xf32>
    %303 = arith.mulf %298, %302 : vector<8x8xf32>
    %304 = arith.truncf %303 : vector<8x8xf32> to vector<8x8xbf16>
    %cst_111 = arith.constant dense<0.000000e+00> : vector<8x8xf32>
    %305 = tpu.matmul %304, %292, %cst_111 {dimension_numbers = #tpu.dot_dimension_numbers<[1], [0], [0], [1], [0, 0, 1, 1], [], []>} : vector<8x8xbf16>, vector<8x8xbf16>, vector<8x8xf32> -> vector<8x8xf32>
    %306 = vector.extract_strided_slice %267 {offsets = [0, 16], sizes = [8, 8], strides = [1, 1]} : vector<8x96xf32> to vector<8x8xf32>
    %307 = arith.truncf %306 : vector<8x8xf32> to vector<8x8xbf16>
    %308 = vector.extract_strided_slice %267 {offsets = [0, 48], sizes = [8, 8], strides = [1, 1]} : vector<8x96xf32> to vector<8x8xf32>
    %309 = arith.truncf %308 : vector<8x8xf32> to vector<8x8xbf16>
    %310 = vector.extract_strided_slice %267 {offsets = [0, 80], sizes = [8, 8], strides = [1, 1]} : vector<8x96xf32> to vector<8x8xf32>
    %311 = arith.truncf %310 : vector<8x8xf32> to vector<8x8xbf16>
    %cst_112 = arith.constant dense<0.000000e+00> : vector<8x8xf32>
    %312 = tpu.matmul %307, %309, %cst_112 {dimension_numbers = #tpu.dot_dimension_numbers<[1], [1], [0], [0], [0, 0, 1, 0], [], []>} : vector<8x8xbf16>, vector<8x8xbf16>, vector<8x8xf32> -> vector<8x8xf32>
    %cst_113 = arith.constant dense<0xFF800000> : vector<8xf32>
    %313 = vector.multi_reduction <maximumf>, %312, %cst_113 [1] : vector<8x8xf32> to vector<8xf32>
    %314 = vector.shape_cast %313 : vector<8xf32> to vector<8x1xf32>
    %315 = vector.broadcast %314 : vector<8x1xf32> to vector<8x8xf32>
    %316 = arith.subf %312, %315 : vector<8x8xf32>
    %317 = math.exp %316 : vector<8x8xf32>
    %cst_114 = arith.constant dense<0.000000e+00> : vector<8xf32>
    %318 = vector.multi_reduction <add>, %317, %cst_114 [1] : vector<8x8xf32> to vector<8xf32>
    %319 = vector.shape_cast %318 : vector<8xf32> to vector<8x1xf32>
    %320 = tpu.reciprocal %319 {approx = true} : vector<8x1xf32> -> vector<8x1xf32>
    %321 = vector.broadcast %320 : vector<8x1xf32> to vector<8x8xf32>
    %322 = arith.mulf %317, %321 : vector<8x8xf32>
    %323 = arith.truncf %322 : vector<8x8xf32> to vector<8x8xbf16>
    %cst_115 = arith.constant dense<0.000000e+00> : vector<8x8xf32>
    %324 = tpu.matmul %323, %311, %cst_115 {dimension_numbers = #tpu.dot_dimension_numbers<[1], [0], [0], [1], [0, 0, 1, 1], [], []>} : vector<8x8xbf16>, vector<8x8xbf16>, vector<8x8xf32> -> vector<8x8xf32>
    %325 = vector.extract_strided_slice %267 {offsets = [0, 24], sizes = [8, 8], strides = [1, 1]} : vector<8x96xf32> to vector<8x8xf32>
    %326 = arith.truncf %325 : vector<8x8xf32> to vector<8x8xbf16>
    %327 = vector.extract_strided_slice %267 {offsets = [0, 56], sizes = [8, 8], strides = [1, 1]} : vector<8x96xf32> to vector<8x8xf32>
    %328 = arith.truncf %327 : vector<8x8xf32> to vector<8x8xbf16>
    %329 = vector.extract_strided_slice %267 {offsets = [0, 88], sizes = [8, 8], strides = [1, 1]} : vector<8x96xf32> to vector<8x8xf32>
    %330 = arith.truncf %329 : vector<8x8xf32> to vector<8x8xbf16>
    %cst_116 = arith.constant dense<0.000000e+00> : vector<8x8xf32>
    %331 = tpu.matmul %326, %328, %cst_116 {dimension_numbers = #tpu.dot_dimension_numbers<[1], [1], [0], [0], [0, 0, 1, 0], [], []>} : vector<8x8xbf16>, vector<8x8xbf16>, vector<8x8xf32> -> vector<8x8xf32>
    %cst_117 = arith.constant dense<0xFF800000> : vector<8xf32>
    %332 = vector.multi_reduction <maximumf>, %331, %cst_117 [1] : vector<8x8xf32> to vector<8xf32>
    %333 = vector.shape_cast %332 : vector<8xf32> to vector<8x1xf32>
    %334 = vector.broadcast %333 : vector<8x1xf32> to vector<8x8xf32>
    %335 = arith.subf %331, %334 : vector<8x8xf32>
    %336 = math.exp %335 : vector<8x8xf32>
    %cst_118 = arith.constant dense<0.000000e+00> : vector<8xf32>
    %337 = vector.multi_reduction <add>, %336, %cst_118 [1] : vector<8x8xf32> to vector<8xf32>
    %338 = vector.shape_cast %337 : vector<8xf32> to vector<8x1xf32>
    %339 = tpu.reciprocal %338 {approx = true} : vector<8x1xf32> -> vector<8x1xf32>
    %340 = vector.broadcast %339 : vector<8x1xf32> to vector<8x8xf32>
    %341 = arith.mulf %336, %340 : vector<8x8xf32>
    %342 = arith.truncf %341 : vector<8x8xf32> to vector<8x8xbf16>
    %cst_119 = arith.constant dense<0.000000e+00> : vector<8x8xf32>
    %343 = tpu.matmul %342, %330, %cst_119 {dimension_numbers = #tpu.dot_dimension_numbers<[1], [0], [0], [1], [0, 0, 1, 1], [], []>} : vector<8x8xbf16>, vector<8x8xbf16>, vector<8x8xf32> -> vector<8x8xf32>
    %344 = tpu.concatenate %286, %305, %324, %343 in 1 : vector<8x8xf32>, vector<8x8xf32>, vector<8x8xf32>, vector<8x8xf32> -> vector<8x32xf32>
    %345 = arith.truncf %344 : vector<8x32xf32> to vector<8x32xbf16>
    %c2_120 = arith.constant 2 : index
    %c0_121 = arith.constant 0 : index
    %c0_122 = arith.constant 0 : index
    %346 = vector.load %arg4[%c2_120, %c0_121, %c0_122] : memref<3x32x32xbf16, #tpu.memory_space<vmem>>, vector<1x32x32xbf16>
    %347 = vector.shape_cast %346 : vector<1x32x32xbf16> to vector<32x32xbf16>
    %cst_123 = arith.constant dense<0.000000e+00> : vector<8x32xf32>
    %348 = tpu.matmul %345, %347, %cst_123 {dimension_numbers = #tpu.dot_dimension_numbers<[1], [0], [0], [1], [0, 0, 1, 1], [], []>} : vector<8x32xbf16>, vector<32x32xbf16>, vector<8x32xf32> -> vector<8x32xf32>
    %c2_124 = arith.constant 2 : index
    %c0_125 = arith.constant 0 : index
    %c0_126 = arith.constant 0 : index
    %349 = vector.load %arg5[%c2_124, %c0_125, %c0_126] : memref<3x1x32xf32, #tpu.memory_space<vmem>>, vector<1x1x32xf32>
    %350 = vector.shape_cast %349 : vector<1x1x32xf32> to vector<1x32xf32>
    %351 = vector.broadcast %350 : vector<1x32xf32> to vector<8x32xf32>
    %352 = arith.addf %348, %351 : vector<8x32xf32>
    %353 = arith.addf %259, %352 : vector<8x32xf32>
    %354 = arith.truncf %353 : vector<8x32xf32> to vector<8x32xbf16>
    %c2_127 = arith.constant 2 : index
    %c0_128 = arith.constant 0 : index
    %c0_129 = arith.constant 0 : index
    %355 = vector.load %arg6[%c2_127, %c0_128, %c0_129] : memref<3x32x64xbf16, #tpu.memory_space<vmem>>, vector<1x32x64xbf16>
    %356 = vector.shape_cast %355 : vector<1x32x64xbf16> to vector<32x64xbf16>
    %cst_130 = arith.constant dense<0.000000e+00> : vector<8x64xf32>
    %357 = tpu.matmul %354, %356, %cst_130 {dimension_numbers = #tpu.dot_dimension_numbers<[1], [0], [0], [1], [0, 0, 1, 1], [], []>} : vector<8x32xbf16>, vector<32x64xbf16>, vector<8x64xf32> -> vector<8x64xf32>
    %c2_131 = arith.constant 2 : index
    %c0_132 = arith.constant 0 : index
    %c0_133 = arith.constant 0 : index
    %358 = vector.load %arg7[%c2_131, %c0_132, %c0_133] : memref<3x1x64xf32, #tpu.memory_space<vmem>>, vector<1x1x64xf32>
    %359 = vector.shape_cast %358 : vector<1x1x64xf32> to vector<1x64xf32>
    %360 = vector.broadcast %359 : vector<1x64xf32> to vector<8x64xf32>
    %361 = arith.addf %357, %360 : vector<8x64xf32>
    %cst_134 = arith.constant 1.000000e+00 : f32
    %362 = vector.broadcast %cst_134 : f32 to vector<8x64xf32>
    %363 = arith.subf %361, %362 : vector<8x64xf32>
    %364 = arith.negf %363 : vector<8x64xf32>
    %365 = math.exp %364 : vector<8x64xf32>
    %cst_135 = arith.constant 1.000000e+00 : f32
    %366 = vector.broadcast %cst_135 : f32 to vector<8x64xf32>
    %367 = arith.addf %366, %365 : vector<8x64xf32>
    %368 = arith.divf %366, %367 : vector<8x64xf32>
    %369 = arith.mulf %361, %368 : vector<8x64xf32>
    %370 = arith.truncf %369 : vector<8x64xf32> to vector<8x64xbf16>
    %c2_136 = arith.constant 2 : index
    %c0_137 = arith.constant 0 : index
    %c0_138 = arith.constant 0 : index
    %371 = vector.load %arg8[%c2_136, %c0_137, %c0_138] : memref<3x64x32xbf16, #tpu.memory_space<vmem>>, vector<1x64x32xbf16>
    %372 = vector.shape_cast %371 : vector<1x64x32xbf16> to vector<64x32xbf16>
    %cst_139 = arith.constant dense<0.000000e+00> : vector<8x32xf32>
    %373 = tpu.matmul %370, %372, %cst_139 {dimension_numbers = #tpu.dot_dimension_numbers<[1], [0], [0], [1], [0, 0, 1, 1], [], []>} : vector<8x64xbf16>, vector<64x32xbf16>, vector<8x32xf32> -> vector<8x32xf32>
    %c2_140 = arith.constant 2 : index
    %c0_141 = arith.constant 0 : index
    %c0_142 = arith.constant 0 : index
    %374 = vector.load %arg9[%c2_140, %c0_141, %c0_142] : memref<3x1x32xf32, #tpu.memory_space<vmem>>, vector<1x1x32xf32>
    %375 = vector.shape_cast %374 : vector<1x1x32xf32> to vector<1x32xf32>
    %376 = vector.broadcast %375 : vector<1x32xf32> to vector<8x32xf32>
    %377 = arith.addf %373, %376 : vector<8x32xf32>
    %378 = arith.addf %353, %377 : vector<8x32xf32>
    %379 = arith.mulf %378, %378 : vector<8x32xf32>
    %cst_143 = arith.constant dense<0.000000e+00> : vector<8xf32>
    %380 = vector.multi_reduction <add>, %379, %cst_143 [1] : vector<8x32xf32> to vector<8xf32>
    %381 = vector.shape_cast %380 : vector<8xf32> to vector<8x1xf32>
    %cst_144 = arith.constant 3.200000e+01 : f32
    %382 = vector.broadcast %cst_144 : f32 to vector<8x1xf32>
    %383 = arith.divf %381, %382 : vector<8x1xf32>
    %cst_145 = arith.constant 2.500000e-01 : f32
    %384 = vector.broadcast %cst_145 : f32 to vector<8x1xf32>
    %385 = arith.addf %383, %384 : vector<8x1xf32>
    %386 = math.rsqrt %385 : vector<8x1xf32>
    %387 = vector.broadcast %386 : vector<8x1xf32> to vector<8x32xf32>
    %388 = arith.mulf %378, %387 : vector<8x32xf32>
    %c0_146 = arith.constant 0 : index
    %c0_147 = arith.constant 0 : index
    %c0_148 = arith.constant 0 : index
    %389 = vector.load %arg10[%c0_146, %c0_147, %c0_148] : memref<1x8x32xf32, #tpu.memory_space<vmem>>, vector<1x8x32xf32>
    %390 = vector.shape_cast %389 : vector<1x8x32xf32> to vector<8x32xf32>
    %391 = vector.shape_cast %388 : vector<8x32xf32> to vector<1x8x32xf32>
    tpu.vector_store %arg10[%c0_146, %c0_147, %c0_148], %391 {strides = array<i32>} : memref<1x8x32xf32, #tpu.memory_space<vmem>>, vector<1x8x32xf32>,
    return
  }
  func.func @transform_0(%arg0: i32) -> (i32, i32, i32) {
    %c0_i32 = arith.constant 0 : i32
    %c0_i32_0 = arith.constant 0 : i32
    %c0_i32_1 = arith.constant 0 : i32
    return %arg0, %c0_i32, %c0_i32_0 : i32, i32, i32
  }
  func.func @transform_1(%arg0: i32) -> (i32, i32, i32) {
    %c0_i32 = arith.constant 0 : i32
    %c0_i32_0 = arith.constant 0 : i32
    %c0_i32_1 = arith.constant 0 : i32
    %c0_i32_2 = arith.constant 0 : i32
    return %c0_i32, %c0_i32_0, %c0_i32_1 : i32, i32, i32
  }
  func.func @transform_2(%arg0: i32) -> (i32, i32, i32) {
    %c0_i32 = arith.constant 0 : i32
    %c0_i32_0 = arith.constant 0 : i32
    %c0_i32_1 = arith.constant 0 : i32
    %c0_i32_2 = arith.constant 0 : i32
    return %c0_i32, %c0_i32_0, %c0_i32_1 : i32, i32, i32
  }
  func.func @transform_3(%arg0: i32) -> (i32, i32, i32) {
    %c0_i32 = arith.constant 0 : i32
    %c0_i32_0 = arith.constant 0 : i32
    %c0_i32_1 = arith.constant 0 : i32
    %c0_i32_2 = arith.constant 0 : i32
    return %c0_i32, %c0_i32_0, %c0_i32_1 : i32, i32, i32
  }
  func.func @transform_4(%arg0: i32) -> (i32, i32, i32) {
    %c0_i32 = arith.constant 0 : i32
    %c0_i32_0 = arith.constant 0 : i32
    %c0_i32_1 = arith.constant 0 : i32
    %c0_i32_2 = arith.constant 0 : i32
    return %c0_i32, %c0_i32_0, %c0_i32_1 : i32, i32, i32
  }
  func.func @transform_5(%arg0: i32) -> (i32, i32, i32) {
    %c0_i32 = arith.constant 0 : i32
    %c0_i32_0 = arith.constant 0 : i32
    %c0_i32_1 = arith.constant 0 : i32
    %c0_i32_2 = arith.constant 0 : i32
    return %c0_i32, %c0_i32_0, %c0_i32_1 : i32, i32, i32
  }
  func.func @transform_6(%arg0: i32) -> (i32, i32, i32) {
    %c0_i32 = arith.constant 0 : i32
    %c0_i32_0 = arith.constant 0 : i32
    %c0_i32_1 = arith.constant 0 : i32
    %c0_i32_2 = arith.constant 0 : i32
    return %c0_i32, %c0_i32_0, %c0_i32_1 : i32, i32, i32
  }
  func.func @transform_7(%arg0: i32) -> (i32, i32, i32) {
    %c0_i32 = arith.constant 0 : i32
    %c0_i32_0 = arith.constant 0 : i32
    %c0_i32_1 = arith.constant 0 : i32
    %c0_i32_2 = arith.constant 0 : i32
    return %c0_i32, %c0_i32_0, %c0_i32_1 : i32, i32, i32
  }
  func.func @transform_8(%arg0: i32) -> (i32, i32, i32) {
    %c0_i32 = arith.constant 0 : i32
    %c0_i32_0 = arith.constant 0 : i32
    %c0_i32_1 = arith.constant 0 : i32
    %c0_i32_2 = arith.constant 0 : i32
    return %c0_i32, %c0_i32_0, %c0_i32_1 : i32, i32, i32
  }
  func.func @transform_9(%arg0: i32) -> (i32, i32, i32) {
    %c0_i32 = arith.constant 0 : i32
    %c0_i32_0 = arith.constant 0 : i32
    %c0_i32_1 = arith.constant 0 : i32
    return %arg0, %c0_i32, %c0_i32_0 : i32, i32, i32
  }
}

</mosaic_0001>

<bundles_post_ra>
// kernel: transformer_encoder_forward.1
= control target key start
LH: loop header
LB: loop body
LE: loop exit
PB: predicated region body
PF: predicated region fallthrough
CT: control target
= control target key end

     0   :  { %s4746_s0 = inlined_call_operand.hbm [shape: f32[2,8,32], index: 0, kind: input, shape index: {}]   ;;  %s4747_s1 = inlined_call_operand.hbm [shape: bf16[3,32,96], index: 1, kind: input, shape index: {}]   ;;  %s4748_s2 = inlined_call_operand.hbm [shape: f32[3,1,96], index: 2, kind: input, shape index: {}]   ;;  %s4749_s3 = inlined_call_operand.hbm [shape: bf16[3,32,32], index: 3, kind: input, shape index: {}]   ;;  %s4750_s4 = inlined_call_operand.hbm [shape: f32[3,1,32], index: 4, kind: input, shape index: {}]   ;;  %s4751_s5 = inlined_call_operand.hbm [shape: bf16[3,32,64], index: 5, kind: input, shape index: {}]   ;;  %s4752_s6 = inlined_call_operand.hbm [shape: f32[3,1,64], index: 6, kind: input, shape index: {}]   ;;  %s4753_s7 = inlined_call_operand.hbm [shape: bf16[3,64,32], index: 7, kind: input, shape index: {}]   ;;  %s4754_s8 = inlined_call_operand.hbm [shape: f32[3,1,32], index: 8, kind: input, shape index: {}]   ;;  %s4755_s9 = inlined_call_operand.hbm [shape: f32[2,8,32], index: 9, kind: output, shape index: {}]  }
   0x1   :  { %4761 = sst [smem:[#allocation24_spill]] %s4747_s1 }
   0x2   :  { %4762 = sst [smem:[#allocation25_spill]] %s4749_s3 }
   0x3   :  { %4763 = sst [smem:[#allocation26_spill]] %s4755_s9 }
   0x4   :  { %14 = vsyncpa [#allocation3], 0 }
   0x5   :  { %16 = vsyncpa [#allocation3 + $0x1], 0 }
   0x6   :  { %17 = vsyncpa [#allocation6], 0 }
   0x7   :  { %18 = vsyncpa [#allocation9], 0 }
   0x8   :  { %19 = vsyncpa [#allocation12], 0 }
   0x9   :  { %20 = vsyncpa [#allocation15], 0 }
   0xa   :  { %21 = vsyncpa [#allocation4], 0 }
   0xb   :  { %23 = vsyncpa [#allocation4 + $0x1], 0  ;;  %s4036_s30 = smov 0   ;;  %s4038_s10 = smov 0  }
   0xc   :  { %s4040_s11 = smov 0   ;;  %s4042_s12 = smov 0  }
   0xd LB: > { %s3956_s13 = smov [#allocation5]   ;;  %s4057_s15 = sadd.s32 4294967295, %s3954_s12   ;;  %s3954_s12 = sphi %s4042_s12, %s4792_s12   ;;  %s3950_s11 = sphi %s4040_s11, %s4791_s11   ;;  %s3946_s10 = sphi %s4038_s10, %s4790_s10   ;;  %s3942_s30 = sphi %s4036_s30, %s4789_s30  }
   0xe   : > { %s266_s14 = sshll.u32 %s3956_s13, 4  ;;  %p2922_p0 = scmp.ge.s32.totalorder %s3954_s12, 1  ;;  %s4062_s14 = int_to_ptr.vmem [resolvable:$true] %s266_s14 }
   0xf   : > { %p4757_p1 = scmp.eq.s32.totalorder %s4057_s15, 0  ;;  %p254_p2 = scmp.lt.s32.totalorder %s3954_s12, 3 }
  0x10   : > { %s3957_s17 = smov [#allocation8]   ;;  %s3958_s20 = smov [#allocation11]  }
  0x11   : > { %p4064_p3 = pnand %p2922_p0, %p254_p2  ;;  %s292_s18 = sshll.u32 %s3957_s17, 4  ;;  %s4077_s18 = int_to_ptr.vmem [resolvable:$true] %s292_s18 }
  0x12   : > { %s318_s21 = sshll.u32 %s3958_s20, 4  ;;  %s4766_s1 = sld [smem:[#allocation24_spill]]  ;;  %s4079_s21 = int_to_ptr.vmem [resolvable:$true] %s318_s21 }
  0x13   : > { %s4764_s16 = scalar_select %p4064_p3, 1, 0 }
  0x14   : > { %p3411_p5 = pneg %p4064_p3 }
  0x16   : > { %p4073_p6 = pnand %p3411_p5, %p4757_p1 }
  0x18   : > { %s3618_s24 = scalar_lea.hbm %s4766_s1, 768  ;;  %p4089_p8 = pneg %p4073_p6 }
  0x19   : > { %p3619_p7 = scmp.ne.s32.totalorder %s4766_s1, %s3618_s24  ;;  %p3625_p11 = scmp.lt.u32.totalorder %s3618_s24, %s4766_s1 }
  0x1b   : > { %p3621_p9 = pnand %p4089_p8, %p3619_p7 }
  0x1d   : > { %p3622_p10 = pneg %p3621_p9 }
  0x1f   : > { %p3627_p12 = pnand %p3625_p11, %p3622_p10 }
  0x21   : > { %3630 = shalt.err (!%p3627_p12)
}
  0x22   : > { %s3631_s13 = scalar_lea.vmem %s4062_s14, 768  ;;  %p3639_p5 = scmp.lt.s32.totalorder %s4062_s14, %s4062_s14 }
  0x23   : > { %p3632_p13 = scmp.ne.s32.totalorder %s4062_s14, %s3631_s13  ;;  %p3640_p4 = scmp.lt.s32.totalorder %s3631_s13, %s3631_s13 }
  0x25   : > { %p3634_p0 = pnand %p3632_p13, %p4089_p8  ;;  %p3641_p7 = por %p3640_p4, %p3639_p5 }
  0x27   : > { %p3635_p2 = pneg %p3634_p0 }
  0x29   : > { %p3642_p9 = pnand %p3641_p7, %p3635_p2 }
  0x2b   : > { %3645 = shalt.err (!%p3642_p9)
}
  0x2c   : > { %s3959_s17 = smov 64   ;;  %s3960_s20 = smov 4  }
  0x2d   : > { %3414 = dma.hbm_to_vmem [thread:$0]  (!%p4073_p6), %s4766_s1, 768, %s4062_s14, [#allocation6], %s3959_s17, %s3959_s17, %s3960_s20  }
  0x2e   : > { %s4768_s3 = sld [smem:[#allocation25_spill]] }
  0x34   : > { %s3646_s26 = scalar_lea.hbm %s4768_s3, 768 }
  0x35   : > { %p3647_p4 = scmp.ne.s32.totalorder %s4768_s3, %s3646_s26  ;;  %p3653_p12 = scmp.lt.u32.totalorder %s3646_s26, %s4768_s3 }
  0x37   : > { %p3649_p10 = pnand %p3647_p4, %p4089_p8 }
  0x39   : > { %p3650_p11 = pneg %p3649_p10 }
  0x3b   : > { %p3655_p13 = pnand %p3653_p12, %p3650_p11 }
  0x3d   : > { %3658 = shalt.err (!%p3655_p13)
}
  0x3e   : > { %s3659_s14 = scalar_lea.vmem %s4077_s18, 768  ;;  %p3667_p7 = scmp.lt.s32.totalorder %s4077_s18, %s4077_s18 }
  0x3f   : > { %p3660_p0 = scmp.ne.s32.totalorder %s4077_s18, %s3659_s14  ;;  %p3668_p9 = scmp.lt.s32.totalorder %s3659_s14, %s3659_s14 }
  0x41   : > { %p3662_p2 = pnand %p3660_p0, %p4089_p8  ;;  %p3669_p4 = por %p3668_p9, %p3667_p7 }
  0x43   : > { %p3663_p5 = pneg %p3662_p2 }
  0x45   : > { %p3670_p10 = pnand %p3669_p4, %p3663_p5 }
  0x47   : > { %3673 = shalt.err (!%p3670_p10)
}
  0x48   : > { %3420 = dma.hbm_to_vmem [thread:$0]  (!%p4073_p6), %s4768_s3, 768, %s4077_s18, [#allocation9], %s3959_s17, %s3959_s17, %s3960_s20  }
  0x49   : > { %s3674_s25 = scalar_lea.hbm %s4751_s5, 768 }
  0x4a   : > { %p3675_p11 = scmp.ne.s32.totalorder %s4751_s5, %s3674_s25  ;;  %p3681_p0 = scmp.lt.u32.totalorder %s3674_s25, %s4751_s5 }
  0x4c   : > { %p3677_p12 = pnand %p3675_p11, %p4089_p8 }
  0x4e   : > { %p3678_p13 = pneg %p3677_p12 }
  0x50   : > { %p3683_p2 = pnand %p3681_p0, %p3678_p13 }
  0x52   : > { %3686 = shalt.err (!%p3683_p2)
}
  0x53   : > { %s3687_s18 = scalar_lea.vmem %s4079_s21, 768  ;;  %p3695_p4 = scmp.lt.s32.totalorder %s4079_s21, %s4079_s21 }
  0x54   : > { %p3688_p5 = scmp.ne.s32.totalorder %s4079_s21, %s3687_s18  ;;  %p3696_p10 = scmp.lt.s32.totalorder %s3687_s18, %s3687_s18 }
  0x56   : > { %p3690_p7 = pnand %p3688_p5, %p4089_p8  ;;  %p3697_p11 = por %p3696_p10, %p3695_p4 }
  0x58   : > { %p3691_p9 = pneg %p3690_p7 }
  0x5a   : > { %p3698_p12 = pnand %p3697_p11, %p3691_p9 }
  0x5c   : > { %3701 = shalt.err (!%p3698_p12)
}
  0x5d   : > { %3426 = dma.hbm_to_vmem [thread:$0]  (!%p4073_p6), %s4751_s5, 768, %s4079_s21, [#allocation12], %s3959_s17, %s3959_s17, %s3960_s20  }
  0x5e   : > { %s3961_s22 = smov [#allocation14]   ;;  %s3962_s24 = smov [#allocation7]  }
  0x5f   : > { %s344_s23 = sshll.u32 %s3961_s22, 4  ;;  %s279_s25 = sshll.u32 %s3962_s24, 4  ;;  %s345_s23 = int_to_ptr.vmem [resolvable:$true] %s344_s23  ;;  %s280_s25 = int_to_ptr.vmem [resolvable:$true] %s279_s25 }
  0x60   : > { %s3702_s29 = scalar_lea.hbm %s4753_s7, 1536 }
  0x61   : > { %p3703_p13 = scmp.ne.s32.totalorder %s4753_s7, %s3702_s29  ;;  %p3709_p5 = scmp.lt.u32.totalorder %s3702_s29, %s4753_s7 }
  0x63   : > { %p3705_p0 = pnand %p3703_p13, %p4089_p8 }
  0x65   : > { %p3706_p2 = pneg %p3705_p0 }
  0x67   : > { %p3711_p7 = pnand %p3709_p5, %p3706_p2 }
  0x69   : > { %3714 = shalt.err (!%p3711_p7)
}
  0x6a   : > { %s3715_s21 = scalar_lea.vmem %s345_s23, 1536  ;;  %p3723_p11 = scmp.lt.s32.totalorder %s345_s23, %s345_s23 }
  0x6b   : > { %p3716_p9 = scmp.ne.s32.totalorder %s345_s23, %s3715_s21  ;;  %p3724_p12 = scmp.lt.s32.totalorder %s3715_s21, %s3715_s21 }
  0x6d   : > { %p3718_p4 = pnand %p3716_p9, %p4089_p8  ;;  %p3725_p1 = por %p3724_p12, %p3723_p11 }
  0x6f   : > { %p3719_p10 = pneg %p3718_p4 }
  0x71   : > { %p3726_p3 = pnand %p3725_p1, %p3719_p10 }
  0x73   : > { %3729 = shalt.err (!%p3726_p3)
}
  0x74   : > { %3432 = dma.hbm_to_vmem [thread:$0]  (!%p4073_p6), %s4753_s7, 1536, %s345_s23, [#allocation15], %s3959_s17, %s3959_s17, %s3960_s20  }
  0x75   : > { %s3730_s26 = scalar_lea.hbm %s4748_s2, 48 }
  0x76   : > { %p3731_p1 = scmp.ne.s32.totalorder %s4748_s2, %s3730_s26  ;;  %p3737_p0 = scmp.lt.u32.totalorder %s3730_s26, %s4748_s2 }
  0x78   : > { %p3733_p3 = pnand %p3731_p1, %p4089_p8 }
  0x7a   : > { %p3734_p13 = pneg %p3733_p3 }
  0x7c   : > { %p3739_p2 = pnand %p3737_p0, %p3734_p13 }
  0x7e   : > { %3742 = shalt.err (!%p3739_p2)
}
  0x7f   : > { %s3743_s14 = scalar_lea.vmem %s280_s25, 48  ;;  %s3750_s17 = scalar_lea.vmem %s280_s25, 64 }
  0x80   : > { %p3744_p5 = scmp.ne.s32.totalorder %s280_s25, %s3743_s14  ;;  %p3751_p4 = scmp.lt.s32.totalorder %s280_s25, %s280_s25 }
  0x81   : > { %p3752_p10 = scmp.lt.s32.totalorder %s3750_s17, %s3743_s14 }
  0x82   : > { %p3746_p7 = pnand %p3744_p5, %p4089_p8 }
  0x83   : > { %p3753_p11 = por %p3752_p10, %p3751_p4 }
  0x84   : > { %p3747_p9 = pneg %p3746_p7 }
  0x86   : > { %p3754_p12 = pnand %p3753_p11, %p3747_p9 }
  0x88   : > { %3757 = shalt.err (!%p3754_p12)
}
  0x89   : > { %s3963_s20 = smov 16   ;;  %s3964_s23 = smov 1  }
  0x8a   : > { %3417 = dma.hbm_to_vmem [thread:$0]  (!%p4073_p6), %s4748_s2, 48, %s280_s25, [#allocation6], %s3963_s20, %s3963_s20, %s3964_s23  }
  0x8b   : > { %s3965_s9 = smov [#allocation10]   ;;  %s3966_s24 = smov [#allocation13]  }
  0x8c   : > { %s305_s22 = sshll.u32 %s3965_s9, 4  ;;  %s331_s26 = sshll.u32 %s3966_s24, 4  ;;  %s306_s22 = int_to_ptr.vmem [resolvable:$true] %s305_s22  ;;  %s332_s26 = int_to_ptr.vmem [resolvable:$true] %s331_s26 }
  0x8d   : > { %s3758_s13 = scalar_lea.hbm %s4750_s4, 48 }
  0x8e   : > { %p3759_p1 = scmp.ne.s32.totalorder %s4750_s4, %s3758_s13  ;;  %p3765_p0 = scmp.lt.u32.totalorder %s3758_s13, %s4750_s4 }
  0x90   : > { %p3761_p3 = pnand %p3759_p1, %p4089_p8 }
  0x92   : > { %p3762_p13 = pneg %p3761_p3 }
  0x94   : > { %p3767_p2 = pnand %p3765_p0, %p3762_p13 }
  0x96   : > { %3770 = shalt.err (!%p3767_p2)
}
  0x97   : > { %s3771_s25 = scalar_lea.vmem %s306_s22, 48  ;;  %s3778_s21 = scalar_lea.vmem %s306_s22, 64 }
  0x98   : > { %p3772_p5 = scmp.ne.s32.totalorder %s306_s22, %s3771_s25  ;;  %p3779_p4 = scmp.lt.s32.totalorder %s306_s22, %s306_s22 }
  0x99   : > { %p3780_p10 = scmp.lt.s32.totalorder %s3778_s21, %s3771_s25 }
  0x9a   : > { %p3774_p7 = pnand %p3772_p5, %p4089_p8 }
  0x9b   : > { %p3781_p11 = por %p3780_p10, %p3779_p4 }
  0x9c   : > { %p3775_p9 = pneg %p3774_p7 }
  0x9e   : > { %p3782_p12 = pnand %p3781_p11, %p3775_p9 }
  0xa0   : > { %3785 = shalt.err (!%p3782_p12)
}
  0xa1   : > { %3423 = dma.hbm_to_vmem [thread:$0]  (!%p4073_p6), %s4750_s4, 48, %s306_s22, [#allocation9], %s3963_s20, %s3963_s20, %s3964_s23  }
  0xa2   : > { %s3786_s28 = scalar_lea.hbm %s4752_s6, 48 }
  0xa3   : > { %p3787_p1 = scmp.ne.s32.totalorder %s4752_s6, %s3786_s28  ;;  %p3793_p0 = scmp.lt.u32.totalorder %s3786_s28, %s4752_s6 }
  0xa5   : > { %p3789_p3 = pnand %p3787_p1, %p4089_p8 }
  0xa7   : > { %p3790_p13 = pneg %p3789_p3 }
  0xa9   : > { %p3795_p2 = pnand %p3793_p0, %p3790_p13 }
  0xab   : > { %3798 = shalt.err (!%p3795_p2)
}
  0xac   : > { %s3799_s17 = scalar_lea.vmem %s332_s26, 48  ;;  %s3806_s22 = scalar_lea.vmem %s332_s26, 64 }
  0xad   : > { %p3800_p5 = scmp.ne.s32.totalorder %s332_s26, %s3799_s17  ;;  %p3807_p4 = scmp.lt.s32.totalorder %s332_s26, %s332_s26 }
  0xae   : > { %p3808_p10 = scmp.lt.s32.totalorder %s3806_s22, %s3799_s17 }
  0xaf   : > { %p3802_p7 = pnand %p3800_p5, %p4089_p8 }
  0xb0   : > { %p3809_p11 = por %p3808_p10, %p3807_p4 }
  0xb1   : > { %p3803_p9 = pneg %p3802_p7 }
  0xb3   : > { %p3810_p12 = pnand %p3809_p11, %p3803_p9 }
  0xb5   : > { %3813 = shalt.err (!%p3810_p12)
}
  0xb6   : > { %3429 = dma.hbm_to_vmem [thread:$0]  (!%p4073_p6), %s4752_s6, 48, %s332_s26, [#allocation12], %s3963_s20, %s3963_s20, %s3964_s23  }
  0xb7   : > { %s3967_s3 = smov [#allocation16]   ;;  %s3814_s28 = scalar_lea.hbm %s4754_s8, 48 }
  0xb8   : > { %s357_s1 = sshll.u32 %s3967_s3, 4  ;;  %p3815_p1 = scmp.ne.s32.totalorder %s4754_s8, %s3814_s28  ;;  %s358_s1 = int_to_ptr.vmem [resolvable:$true] %s357_s1 }
  0xb9   : > { %p3821_p0 = scmp.lt.u32.totalorder %s3814_s28, %s4754_s8 }
  0xba   : > { %p3817_p3 = pnand %p3815_p1, %p4089_p8 }
  0xbc   : > { %p3818_p13 = pneg %p3817_p3 }
  0xbe   : > { %p3823_p2 = pnand %p3821_p0, %p3818_p13 }
  0xc0   : > { %3826 = shalt.err (!%p3823_p2)
}
  0xc1   : > { %s3827_s26 = scalar_lea.vmem %s358_s1, 48  ;;  %s3834_s17 = scalar_lea.vmem %s358_s1, 64 }
  0xc2   : > { %p3828_p5 = scmp.ne.s32.totalorder %s358_s1, %s3827_s26  ;;  %p3835_p4 = scmp.lt.s32.totalorder %s358_s1, %s358_s1 }
  0xc3   : > { %p3836_p10 = scmp.lt.s32.totalorder %s3834_s17, %s3827_s26 }
  0xc4   : > { %p3830_p7 = pnand %p3828_p5, %p4089_p8 }
  0xc5   : > { %p3837_p11 = por %p3836_p10, %p3835_p4 }
  0xc6   : > { %p3831_p9 = pneg %p3830_p7 }
  0xc8   : > { %p3838_p12 = pnand %p3837_p11, %p3831_p9 }
  0xca   : > { %3841 = shalt.err (!%p3838_p12)
}
  0xcb   : > { %3435 = dma.hbm_to_vmem [thread:$0]  (!%p4073_p6), %s4754_s8, 48, %s358_s1, [#allocation15], %s3963_s20, %s3963_s20, %s3964_s23  }
  0xcc   : > { %s2921_s19 = sadd.s32 4294967294, %s3954_s12   ;;  %s4272_s27 = sadd.s32 1, %s3954_s12  }
  0xcd   : > { %s33_s21 = ssub.s32 %s3954_s12, %s4272_s27  ;;  %s36_s3 = sadd.s32 1, %s3950_s11 }
  0xce   : > { %p34_p8 = scmp.eq.s32.totalorder %s33_s21, 0  ;;  %p43_p1 = scmp.ne.s32.totalorder %s3950_s11, %s3946_s10 }
  0xcf   : > { %p44_p3 = scmp.eq.s32.totalorder %s3954_s12, 0  ;;  %p49_p13 = scmp.ne.s32.totalorder %s3946_s10, %s3942_s30 }
  0xd0   : > { %s4283_s9 = scalar_select %p34_p8, %s3950_s11, %s36_s3  }
  0xd1   : > { %p4285_p0 = por %p44_p3, %p43_p1  ;;  %p4770_p2 = scmp.eq.s32.totalorder %s4057_s15, 0 }
  0xd2   : > { %p241_p5 = scmp.eq.s32.totalorder %s4057_s15, 1  ;;  %p247_p7 = scmp.eq.s32.totalorder %s2921_s19, 1 }
  0xd3   : > { %p4291_p6 = por %p4770_p2, %p49_p13  ;;  %p3452_p9 = scmp.lt.s32.totalorder %s3954_s12, 2 }
  0xd4   : > { %s371_s23 = sand.u32 1, %s3950_s11   ;;  %p4298_p4 = por %p241_p5, %p43_p1 }
  0xd5   : > { %p4302_p10 = por %p247_p7, %p49_p13  ;;  %s2932_s29 = sshll.u32 %s371_s23, 3 }
  0xd6   : > { %s4772_s1 = scalar_select %p4298_p4, 1, 0 }
  0xd7   : > { %s4773_s28 = scalar_select %p4302_p10, 1, 0 }
  0xd8   : > { %s2933_s13 = sshll.u32 %s3954_s12, 7  ;;  %s375_s17 = scalar_lea.vmem [#allocation2], %s2932_s29 }
  0xd9   : > { %s4310_s26 = scalar_lea.hbm %s4746_s0, %s2933_s13  ;;  %s382_s22 = sshll.u32 %s375_s17, 4  ;;  %s4312_s22 = int_to_ptr.vmem [resolvable:$true] %s382_s22 }
  0xda   : > { %p4316_p11 = pnand %p3452_p9, %p4285_p0  ;;  %s372_s19 = scalar_lea.sflag [#allocation3], %s371_s23 }
  0xdb   : > { %s3842_s21 = scalar_lea.hbm %s4310_s26, 128  ;;  %s3847_s13 = scalar_lea.hbm %s4746_s0, 256 }
  0xdc   : > { %p3843_p12 = scmp.ne.s32.totalorder %s4310_s26, %s3842_s21  ;;  %p3844_p8 = pneg %p4316_p11 }
  0xdd   : > { %p3848_p13 = scmp.lt.u32.totalorder %s4310_s26, %s4746_s0  ;;  %p3849_p0 = scmp.lt.u32.totalorder %s3847_s13, %s3842_s21 }
  0xde   : > { %p3845_p1 = pnand %p3844_p8, %p3843_p12  ;;  %p3851_p5 = scmp.lt.u32.totalorder %s3842_s21, %s4310_s26 }
  0xdf   : > { %p3850_p2 = por %p3849_p0, %p3848_p13 }
  0xe0   : > { %p3846_p3 = pneg %p3845_p1 }
  0xe1   : > { %p3852_p7 = por %p3851_p5, %p3850_p2 }
  0xe3   : > { %p3853_p9 = pnand %p3852_p7, %p3846_p3 }
  0xe5   : > { %3856 = shalt.err (!%p3853_p9)
}
  0xe6   : > { %s3857_s23 = scalar_lea.vmem %s4312_s22, 128  ;;  %s3968_s14 = smov [#allocation2]  }
  0xe7   : > { %p3858_p12 = scmp.ne.s32.totalorder %s4312_s22, %s3857_s23  ;;  %s3862_s17 = sshll.u32 %s3968_s14, 4  ;;  %s3863_s17 = int_to_ptr.vmem [resolvable:$false] %s3862_s17 }
  0xe8   : > { %s3864_s3 = scalar_lea.vmem %s3863_s17, 256  ;;  %p3865_p4 = scmp.lt.s32.totalorder %s4312_s22, %s3863_s17 }
  0xe9   : > { %p3860_p1 = pnand %p3858_p12, %p3844_p8  ;;  %p3866_p13 = scmp.lt.s32.totalorder %s3864_s3, %s3857_s23 }
  0xeb   : > { %p3861_p10 = pneg %p3860_p1  ;;  %p3867_p0 = por %p3866_p13, %p3865_p4 }
  0xed   : > { %p3868_p2 = pnand %p3867_p0, %p3861_p10 }
  0xef   : > { %3871 = shalt.err (!%p3868_p2)
}
  0xf0   : > { %3439 = dma.hbm_to_vmem [thread:$0]  (!%p4316_p11), %s4310_s26, 128, %s4312_s22, %s372_s19  }
  0xf1   : > { %p4775_p3 = scmp.ne.s32.totalorder %s4764_s16, 0 }
  0xf2   : > { %s4348_s21 = sand.u32 (!%p4775_p3), 1, %s3946_s10  }
  0xf3   : > { %391 = sbr.rel (%p4775_p3) target bundleno = 6520 (0x1978), region = 56  ;;  %s4760_s29 = sshll.u32 (!%p4775_p3), %s4348_s21, 3 }
  0xf4   : > { %s394_s13 = scalar_lea.sflag (!%p4775_p3), [#allocation3], %s4348_s21  ;;  %s397_s24 = scalar_lea.vmem (!%p4775_p3), [#allocation2], %s4760_s29 }
  0xfa   : > { %3917 = dma.done.wait (%p4291_p6), %s394_s13, 128  }
  0xfb   : > { %3919 = vsyncadd (%p4291_p6), %s394_s13, 4294967168  ;;  %p4776_p4 = scmp.eq.s32.totalorder %s4057_s15, 0 }
  0xfd   : > { %3921 = dma.done.wait (%p4776_p4), [#allocation6], 816   ;;  %p4777_p10 = pmov %p4776_p4 }
  0xfe   : > { %p4778_p11 = pmov %p4776_p4 }
  0xff   : > { %3923 = vsyncadd (%p4777_p10), [#allocation6], 4294966480 }
 0x100   : > { %3925 = dma.done.wait (%p4778_p11), [#allocation9], 816   ;;  %p4779_p8 = pmov %p4776_p4 }
 0x101   : > { %p4780_p5 = pmov %p4776_p4 }
 0x102   : > { %3927 = vsyncadd (%p4779_p8), [#allocation9], 4294966480 }
 0x103   : > { %3929 = dma.done.wait (%p4780_p5), [#allocation12], 816   ;;  %p4781_p7 = pmov %p4776_p4 }
 0x104   : > { %p4782_p6 = pmov %p4776_p4 }
 0x105   : > { %3931 = vsyncadd (%p4781_p7), [#allocation12], 4294966480 }
 0x106   : > { %3933 = dma.done.wait (%p4782_p6), [#allocation15], 1584   ;;  %p4783_p9 = pmov %p4776_p4 }
 0x107   : > { %v3969_v0 = vmov 0.0   ;;  %vm3970_vm0 = vmmov 0   ;;  %v3522_v1 = vld [vmem:[#allocation5] sm:$0xff]   ;;  %v3523_v2 = vld [vmem:[#allocation5 + $0x8] sm:$0xff]   ;;  %v4380_v3 = vld [vmem:[%s397_s24] sm:$0xff]  ;;  %vm490_vm1 = vcmask 261120  }
 0x108   : > { %3935 = vsyncadd (%p4783_p9), [#allocation15], 4294965712  ;;  %3123 = vmatprep.subr.bf16.mxu0 %v3969_v0  ;;  %3127 = vmatprep.mubr.msk.bf16.mxu0 %vm3970_vm0, %v3969_v0  ;;  %v466_v4 = vpack.c.bf16 %v4380_v3, %v4380_v3  ;;  %v2945_v5 = vld [vmem:[#allocation7] ss:$0 sm:$0xff]  ;;  %s3971_s16 = smov 120   ;;  %s3972_s20 = smov 96  }
 0x109   : > { %3131 = vmatprep.subr.bf16.mxu1 %v3969_v0  ;;  %3133 = vmatprep.mubr.msk.bf16.mxu1 %vm3970_vm0, %v3969_v0  ;;  %s3973_s26 = smov 80   ;;  %s3974_s22 = smov 88   ;;  %vm538_vm2 = vcmask 64512   ;;  %vm602_vm3 = vcmask 1043456   ;;  %vm989_vm4 = vcmask 130048   ;;  %vm991_vm5 = vcmask 195584  }
 0x10a   : > { %3124 = vmatpush3.bf16.msra.mxu0 %v3522_v1  ;;  %s3975_s25 = smov 72   ;;  %s3976_s19 = smov 112   ;;  %vm1176_vm6 = vcmask 523264  }
 0x10b   : > { %3125 = vmatprep.subr.bf16.mxu0 %v3969_v0  ;;  %s3977_s18 = smov 104   ;;  %s3978_s23 = smov 56  }
 0x10c   : > { %s3979_s14 = smov 64   ;;  %s3980_s17 = smov 40  }
 0x10d   : > { %s3981_s3 = smov 48   ;;  %s3982_s13 = smov 8  }
 0x10e   : > { %3126 = vmatpush3.bf16.msra.mxu0 %v3523_v2  ;;  %s3983_s24 = smov 16   ;;  %s3984_s29 = smov 24  }
 0x10f   : > { %3137 = vmatprep.subr.bf16.mxu0 %v3969_v0  ;;  %p4786_p1 = scmp.ne.s32.totalorder %s4772_s1, 0 }
 0x111   : > { %3128 = vmatmul.mubr.msk.bf16.vlgmr.msra.gmra.mrb[0].mxu0 %vm490_vm1, %v466_v4 }
 0x112   : > { %3139 = vmatprep.mubr.msk.bf16.mxu0 %vm3970_vm0, %v3969_v0 }
 0x1e4   : > { %v528_v6 = vpop.f32.mrb[0].mxu0 }
 0x1e5   : > { %v529_v7 = vadd.f32 %v2945_v5, %v528_v6  ;;  %v3129_v8 = vpop.f32.mrb[1].mxu0 }
 0x1e6   : > { %v531_v9 = vpop.f32.mrb[2].mxu0 }
 0x1e7   : > { %v4389_v10 = vpack.c.bf16 %v529_v7, %v529_v7  ;;  %v3130_v11 = vpop.f32.mrb[3].mxu0 }
 0x1e9   : > { %646 = vrot.lane.b32.xlu1 %v4389_v10, %s3971_s16  ;;  %536 = vrot.lane.b32.xlu0 %v4389_v10, %s3972_s20 }
 0x1ed   : > { %758 = vrot.lane.b32.xlu1 %v4389_v10, %s3973_s26  ;;  %648 = vrot.lane.b32.xlu0 %v4389_v10, %s3974_s22 }
 0x1f1   : > { %868 = vrot.lane.b32.xlu1 %v4389_v10, %s3975_s25  ;;  %756 = vrot.lane.b32.xlu0 %v4389_v10, %s3976_s19 }
 0x1f5   : > { %866 = vrot.lane.b32.xlu0 %v4389_v10, %s3977_s18 }
 0x25b   : > { %v537_v12 = vpop.permute.xlu0 %536  ;;  %v647_v15 = vpop.permute.xlu1 %646 }
 0x25c   : > { %v543_v13 = vsel %vm538_vm2, %v537_v12, 0 }
 0x25d   : > { %3132 = vmatpush3.bf16.xpose.msra.mxu1 %v543_v13 }
 0x25e   : > { %3143 = vmatprep.subr.bf16.mxu1 %v3969_v0 }
 0x25f   : > { %v649_v14 = vpop.permute.xlu0 %648  ;;  %v759_v17 = vpop.permute.xlu1 %758 }
 0x260   : > { %v654_v16 = vsel %vm538_vm2, %v649_v14, 0  ;;  %v764_v18 = vsel %vm538_vm2, %v759_v17, 0 }
 0x263   : > { %v869_v19 = vpop.permute.xlu1 %868  ;;  %v757_v20 = vpop.permute.xlu0 %756 }
 0x264   : > { %3134 = vmatmul.mubr.msk.bf16.vlgmr.msra.gmra.mrb[0].mxu1 %vm538_vm2, %v4389_v10  ;;  %v874_v21 = vsel %vm538_vm2, %v869_v19, 0 }
 0x265   : > { %3144 = vmatpush3.bf16.xpose.msra.mxu1 %v654_v16  ;;  %3145 = vmatprep.mubr.msk.bf16.mxu1 %vm3970_vm0, %v3969_v0 }
 0x266   : > { %3155 = vmatprep.subr.bf16.mxu1 %v3969_v0 }
 0x267   : > { %v867_v22 = vpop.permute.xlu0 %866 }
 0x26c   : > { %3146 = vmatmul.mubr.msk.bf16.vlgmr.msra.gmra.mrb[4].mxu1 %vm538_vm2, %v647_v15 }
 0x26d   : > { %3156 = vmatpush3.bf16.xpose.msra.mxu1 %v764_v18  ;;  %3157 = vmatprep.mubr.msk.bf16.mxu1 %vm3970_vm0, %v3969_v0 }
 0x26e   : > { %3167 = vmatprep.subr.bf16.mxu1 %v3969_v0 }
 0x274   : > { %3158 = vmatmul.mubr.msk.bf16.vlgmr.msra.gmra.mrb[8].mxu1 %vm538_vm2, %v757_v20 }
 0x275   : > { %3168 = vmatpush3.bf16.xpose.msra.mxu1 %v874_v21  ;;  %3169 = vmatprep.mubr.msk.bf16.mxu1 %vm3970_vm0, %v3969_v0 }
 0x276   : > { %3179 = vmatprep.subr.bf16.mxu1 %v3969_v0 }
 0x27c   : > { %3170 = vmatmul.mubr.msk.bf16.vlgmr.msra.gmra.mrb[12].mxu1 %vm538_vm2, %v867_v22 }
 0x27d   : > { %3183 = vmatprep.mubr.msk.bf16.mxu1 %vm3970_vm0, %v3969_v0 }
 0x337   : > { %v579_v23 = vpop.f32.mrb[0].mxu1 }
 0x338   : > { %v3135_v24 = vpop.f32.mrb[1].mxu1  ;;  %v585_v25 = vsel %vm538_vm2, %v579_v23, -inf }
 0x339   : > { %586 = vmax.xlane.f32.xlu1 %v585_v25  ;;  %v582_v26 = vpop.f32.mrb[2].mxu1 }
 0x33a   : > { %v3136_v27 = vpop.f32.mrb[3].mxu1 }
 0x33f   : > { %v690_v28 = vpop.f32.mrb[4].mxu1 }
 0x340   : > { %v3147_v29 = vpop.f32.mrb[5].mxu1  ;;  %v696_v30 = vsel %vm538_vm2, %v690_v28, -inf }
 0x341   : > { %697 = vmax.xlane.f32.xlu0 %v696_v30  ;;  %v693_v31 = vpop.f32.mrb[6].mxu1 }
 0x342   : > { %v3148_v32 = vpop.f32.mrb[7].mxu1 }
 0x347   : > { %v800_v33 = vpop.f32.mrb[8].mxu1 }
 0x348   : > { %v3159_v34 = vpop.f32.mrb[9].mxu1  ;;  %v806_v35 = vsel %vm538_vm2, %v800_v33, -inf }
 0x349   : > { %807 = vmax.xlane.f32.xlu0 %v806_v35  ;;  %v803_v36 = vpop.f32.mrb[10].mxu1  ;;  %v3525_v34 = vld [vmem:[#allocation8 + $0x8] sm:$0xff]  }
 0x34a   : > { %v3160_v37 = vpop.f32.mrb[11].mxu1 }
 0x34f   : > { %v910_v38 = vpop.f32.mrb[12].mxu1 }
 0x350   : > { %v3171_v39 = vpop.f32.mrb[13].mxu1  ;;  %v916_v40 = vsel %vm538_vm2, %v910_v38, -inf }
 0x351   : > { %917 = vmax.xlane.f32.xlu1 %v916_v40  ;;  %v913_v41 = vpop.f32.mrb[14].mxu1 }
 0x352   : > { %v3172_v42 = vpop.f32.mrb[15].mxu1 }
 0x3c6   : > { %v587_v43 = vpop.xlane.xlu1 %586 }
 0x3c7   : > { %v588_v44 = vsub.f32 %v579_v23, %v587_v43 }
 0x3c9   : > { %v589_v45 = vmul.f32 1.442695, %v588_v44 }
 0x3cb   : > { %3552 = vpow2.f32 %v589_v45 }
 0x3ce   : > { %v698_v46 = vpop.xlane.xlu0 %697 }
 0x3cf   : > { %v699_v47 = vsub.f32 %v690_v28, %v698_v46 }
 0x3d1   : > { %v700_v48 = vmul.f32 1.442695, %v699_v47 }
 0x3d3   : > { %3554 = vpow2.f32 %v700_v48 }
 0x3d5   : > { %v3553_v49 = vpop.eup %3552 }
 0x3d6   : > { %v808_v50 = vpop.xlane.xlu0 %807  ;;  %v591_v51 = vsel %vm538_vm2, %v3553_v49, 0.0 }
 0x3d7   : > { %v809_v52 = vsub.f32 %v800_v33, %v808_v50  ;;  %592 = vadd.xlane.f32.xlu0 %v591_v51  ;;  %v3524_v33 = vld [vmem:[#allocation8] sm:$0xff]   ;;  %v3526_v50 = vld [vmem:[#allocation11] sm:$0xff]  }
 0x3d8   : > { %3180 = vmatpush3.bf16.msra.mxu1 %v3524_v33  ;;  %v3527_v51 = vld [vmem:[#allocation11 + $0x8] sm:$0xff]  }
 0x3d9   : > { %v810_v53 = vmul.f32 1.442695, %v809_v52  ;;  %3181 = vmatprep.subr.bf16.mxu1 %v3969_v0  ;;  %v2957_v52 = vld [vmem:[#allocation10] ss:$0 sm:$0xff] }
 0x3db   : > { %3556 = vpow2.f32 %v810_v53 }
 0x3dc   : > { %3182 = vmatpush3.bf16.msra.mxu1 %v3525_v34 }
 0x3dd   : > { %v3555_v54 = vpop.eup %3554  ;;  %3195 = vmatprep.subr.bf16.mxu1 %v3969_v0 }
 0x3de   : > { %v702_v55 = vsel %vm538_vm2, %v3555_v54, 0.0  ;;  %v918_v58 = vpop.xlane.xlu1 %917 }
 0x3df   : > { %703 = vadd.xlane.f32.xlu1 %v702_v55  ;;  %v919_v59 = vsub.f32 %v910_v38, %v918_v58 }
 0x3e1   : > { %v920_v60 = vmul.f32 1.442695, %v919_v59 }
 0x3e3   : > { %3558 = vpow2.f32 %v920_v60  ;;  %v3528_v60 = vld [vmem:[#allocation14] sm:$0xff]  }
 0x3e5   : > { %v3557_v56 = vpop.eup %3556 }
 0x3e6   : > { %v812_v57 = vsel %vm538_vm2, %v3557_v56, 0.0 }
 0x3e7   : > { %813 = vadd.xlane.f32.xlu0 %v812_v57 }
 0x3ed   : > { %v3559_v61 = vpop.eup %3558 }
 0x3ee   : > { %v922_v62 = vsel %vm538_vm2, %v3559_v61, 0.0 }
 0x3f0   : > { %708 = vrot.lane.b32.xlu1 %v4389_v10, %s3978_s23 }
 0x3fd   : > { %597 = vrot.lane.b32.xlu0 %v4389_v10, %s3979_s14 }
 0x401   : > { %928 = vrot.lane.b32.xlu0 %v4389_v10, %s3980_s17 }
 0x414   : > { %923 = vadd.xlane.f32.xlu1 %v922_v62  ;;  %v3530_v62 = vld [vmem:[#allocation14 + $0x10] sm:$0xff]  }
 0x425   : > { %818 = vrot.lane.b32.xlu1 %v4389_v10, %s3981_s3 }
 0x464   : > { %v593_v63 = vpop.xlane.xlu0 %592 }
 0x465   : > { %3560 = vrcp.f32 %v593_v63  ;;  %v2961_v63 = vld [vmem:[#allocation13] ss:$0 sm:$0xff] }
 0x46c   : > { %v704_v1 = vpop.xlane.xlu1 %703 }
 0x46d   : > { %3562 = vrcp.f32 %v704_v1 }
 0x46f   : > { %v3561_v2 = vpop.eup %3560 }
 0x470   : > { %v595_v5 = vmul.f32 %v3561_v2, %v3553_v49  ;;  %v709_v8 = vpop.permute.xlu1 %708 }
 0x471   : > { %v714_v12 = vsel %vm602_vm3, %v709_v8, 0 }
 0x472   : > { %v596_v9 = vpack.c.bf16 %v595_v5, %v595_v5 }
 0x474   : > { %v814_v4 = vpop.xlane.xlu0 %813 }
 0x475   : > { %3564 = vrcp.f32 %v814_v4 }
 0x477   : > { %v3563_v11 = vpop.eup %3562 }
 0x478   : > { %v598_v6 = vpop.permute.xlu0 %597  ;;  %v706_v10 = vmul.f32 %v3563_v11, %v3555_v54 }
 0x479   : > { %v604_v7 = vsel %vm602_vm3, %v598_v6, 0 }
 0x47a   : > { %3138 = vmatpush3.bf16.msra.mxu0 %v604_v7  ;;  %v707_v13 = vpack.c.bf16 %v706_v10, %v706_v10 }
 0x47b   : > { %3149 = vmatprep.subr.bf16.mxu0 %v3969_v0 }
 0x47c   : > { %v929_v19 = vpop.permute.xlu0 %928 }
 0x47d   : > { %3140 = vmatmul.mubr.msk.bf16.vlgmr.msra.gmra.mrb[4].mxu0 %vm538_vm2, %v596_v9  ;;  %v934_v21 = vsel %vm602_vm3, %v929_v19, 0 }
 0x47e   : > { %3150 = vmatpush3.bf16.msra.mxu0 %v714_v12  ;;  %3151 = vmatprep.mubr.msk.bf16.mxu0 %vm3970_vm0, %v3969_v0 }
 0x47f   : > { %3161 = vmatprep.subr.bf16.mxu0 %v3969_v0  ;;  %v3565_v14 = vpop.eup %3564 }
 0x480   : > { %v816_v16 = vmul.f32 %v3565_v14, %v3557_v56  ;;  %v2967_v14 = vld [vmem:[#allocation16] ss:$0 sm:$0xff] }
 0x482   : > { %v817_v20 = vpack.c.bf16 %v816_v16, %v816_v16 }
 0x485   : > { %3152 = vmatmul.mubr.msk.bf16.vlgmr.msra.gmra.mrb[8].mxu0 %vm538_vm2, %v707_v13 }
 0x486   : > { %3163 = vmatprep.mubr.msk.bf16.mxu0 %vm3970_vm0, %v3969_v0 }
 0x4a1   : > { %v924_v15 = vpop.xlane.xlu1 %923 }
 0x4a2   : > { %3566 = vrcp.f32 %v924_v15 }
 0x4a5   : > { %v819_v17 = vpop.permute.xlu1 %818 }
 0x4a6   : > { %v824_v18 = vsel %vm602_vm3, %v819_v17, 0 }
 0x4a7   : > { %3162 = vmatpush3.bf16.msra.mxu0 %v824_v18 }
 0x4a8   : > { %3173 = vmatprep.subr.bf16.mxu0 %v3969_v0 }
 0x4aa   : > { %3164 = vmatmul.mubr.msk.bf16.vlgmr.msra.gmra.mrb[12].mxu0 %vm538_vm2, %v817_v20 }
 0x4ab   : > { %3174 = vmatpush3.bf16.msra.mxu0 %v934_v21  ;;  %3175 = vmatprep.mubr.msk.bf16.mxu0 %vm3970_vm0, %v3969_v0 }
 0x4ac   : > { %v3567_v22 = vpop.eup %3566  ;;  %3187 = vmatprep.subr.bf16.mxu0 %v3969_v0 }
 0x4ad   : > { %v926_v23 = vmul.f32 %v3567_v22, %v3559_v61  ;;  %v3529_v61 = vld [vmem:[#allocation14 + $0x8] sm:$0xff]  }
 0x4af   : > { %v927_v24 = vpack.c.bf16 %v926_v23, %v926_v23  ;;  %v3532_v23 = vld [vmem:[#allocation5 + $0x10] sm:$0xff]  }
 0x4b2   : > { %3176 = vmatmul.mubr.msk.bf16.vlgmr.msra.gmra.mrb[16].mxu0 %vm538_vm2, %v927_v24  ;;  %v3533_v24 = vld [vmem:[#allocation5 + $0x18] sm:$0xff]  }
 0x4b3   : > { %3191 = vmatprep.mubr.msk.bf16.mxu0 %vm3970_vm0, %v3969_v0  ;;  %3188 = vmatpush3.bf16.msra.mxu0 %v3526_v50 }
 0x4b4   : > { %3189 = vmatprep.subr.bf16.mxu0 %v3969_v0 }
 0x4b7   : > { %3190 = vmatpush3.bf16.msra.mxu0 %v3527_v51 }
 0x4b8   : > { %3207 = vmatprep.subr.bf16.mxu0 %v3969_v0 }
 0x550   : > { %v640_v25 = vpop.f32.mrb[4].mxu0 }
 0x551   : > { %v3141_v26 = vpop.f32.mrb[5].mxu0 }
 0x552   : > { %v643_v27 = vpop.f32.mrb[6].mxu0 }
 0x553   : > { %v3142_v28 = vpop.f32.mrb[7].mxu0 }
 0x558   : > { %v750_v29 = vpop.f32.mrb[8].mxu0 }
 0x559   : > { %977 = vrot.lane.b32.xlu1 %v750_v29, %s3982_s13  ;;  %v3153_v30 = vpop.f32.mrb[9].mxu0 }
 0x55a   : > { %v753_v31 = vpop.f32.mrb[10].mxu0 }
 0x55b   : > { %v3154_v32 = vpop.f32.mrb[11].mxu0  ;;  %v2973_v31 = vld [vmem:[#allocation7 + $0x1] ss:$0 sm:$0xff] }
 0x57d   : > { %v860_v35 = vpop.f32.mrb[12].mxu0 }
 0x57e   : > { %981 = vrot.lane.b32.xlu0 %v860_v35, %s3983_s24  ;;  %v3165_v36 = vpop.f32.mrb[13].mxu0 }
 0x57f   : > { %v863_v37 = vpop.f32.mrb[14].mxu0 }
 0x580   : > { %v3166_v38 = vpop.f32.mrb[15].mxu0 }
 0x585   : > { %v970_v39 = vpop.f32.mrb[16].mxu0 }
 0x586   : > { %985 = vrot.lane.b32.xlu1 %v970_v39, %s3984_s29  ;;  %v3177_v40 = vpop.f32.mrb[17].mxu0 }
 0x587   : > { %v973_v41 = vpop.f32.mrb[18].mxu0 }
 0x588   : > { %v3178_v42 = vpop.f32.mrb[19].mxu0 }
 0x5cb   : > { %v978_v43 = vpop.permute.xlu1 %977 }
 0x5cc   : > { %v988_v45 = vsel %vm538_vm2, %v640_v25, %v978_v43 }
 0x5f0   : > { %v982_v44 = vpop.permute.xlu0 %981 }
 0x5f1   : > { %v990_v46 = vsel %vm989_vm4, %v988_v45, %v982_v44 }
 0x5f8   : > { %v986_v47 = vpop.permute.xlu1 %985 }
 0x5f9   : > { %v992_v48 = vsel %vm991_vm5, %v990_v46, %v986_v47 }
 0x5fa   : > { %v993_v49 = vpack.c.bf16 %v992_v48, %v992_v48 }
 0x5fc   : > { %3184 = vmatmul.mubr.msk.bf16.vlgmr.msra.gmra.mrb[16].mxu1 %vm490_vm1, %v993_v49 }
 0x5fd   : > { %3203 = vmatprep.mubr.msk.bf16.mxu1 %vm3970_vm0, %v3969_v0  ;;  %3196 = vmatpush3.bf16.msra.mxu1 %v3528_v60 }
 0x5fe   : > { %3197 = vmatprep.subr.bf16.mxu1 %v3969_v0 }
 0x601   : > { %3198 = vmatpush3.bf16.msra.mxu1 %v3529_v61 }
 0x602   : > { %3199 = vmatprep.subr.bf16.mxu1 %v3969_v0 }
 0x605   : > { %3200 = vmatpush3.bf16.msra.mxu1 %v3530_v62 }
 0x606   : > { %3201 = vmatprep.subr.bf16.mxu1 %v3969_v0 }
 0x6cf   : > { %v1054_v53 = vpop.f32.mrb[16].mxu1 }
 0x6d0   : > { %v1055_v54 = vadd.f32 %v2957_v52, %v1054_v53  ;;  %v3185_v55 = vpop.f32.mrb[17].mxu1 }
 0x6d1   : > { %v1057_v56 = vpop.f32.mrb[18].mxu1 }
 0x6d2   : > { %v1060_v57 = vadd.f32 %v1055_v54, %v4380_v3  ;;  %v3186_v58 = vpop.f32.mrb[19].mxu1  ;;  %v3531_v3 = vld [vmem:[#allocation14 + $0x18] sm:$0xff]  }
 0x6d3   : > { %3202 = vmatpush3.bf16.msra.mxu1 %v3531_v3 }
 0x6d4   : > { %v1061_v59 = vpack.c.bf16 %v1060_v57, %v1060_v57  ;;  %3221 = vmatprep.subr.bf16.mxu1 %v3969_v0 }
 0x6d6   : > { %3192 = vmatmul.mubr.msk.bf16.vlgmr.msra.gmra.mrb[20].mxu0 %vm490_vm1, %v1061_v59 }
 0x6d7   : > { %3211 = vmatprep.mubr.msk.bf16.mxu0 %vm3970_vm0, %v3969_v0  ;;  %3208 = vmatpush3.bf16.msra.mxu0 %v3532_v23 }
 0x6d8   : > { %3209 = vmatprep.subr.bf16.mxu0 %v3969_v0 }
 0x6db   : > { %3210 = vmatpush3.bf16.msra.mxu0 %v3533_v24 }
 0x6dc   : > { %3215 = vmatprep.subr.bf16.mxu0 %v3969_v0 }
 0x7a9   : > { %v1122_v1 = vpop.f32.mrb[20].mxu0 }
 0x7aa   : > { %v1123_v2 = vadd.f32 %v2961_v63, %v1122_v1  ;;  %v3193_v4 = vpop.f32.mrb[21].mxu0 }
 0x7ab   : > { %v1125_v5 = vpop.f32.mrb[22].mxu0 }
 0x7ac   : > { %v2965_v6 = vadd.f32 -1.0, %v1123_v2  ;;  %v3194_v7 = vpop.f32.mrb[23].mxu0 }
 0x7ae   : > { %v2966_v8 = vmul.f32 -1.442695, %v2965_v6 }
 0x7b0   : > { %3568 = vpow2.f32 %v2966_v8 }
 0x7ba   : > { %v3569_v9 = vpop.eup %3568 }
 0x7bb   : > { %v1132_v11 = vadd.f32 1.0, %v3569_v9 }
 0x7bd   : > { %3570 = vrcp.f32 %v1132_v11 }
 0x7c7   : > { %v3571_v12 = vpop.eup %3570 }
 0x7c8   : > { %v1135_v10 = vmul.f32 %v3571_v12, %v1123_v2 }
 0x7ca   : > { %v1136_v13 = vpack.c.bf16 %v1135_v10, %v1135_v10 }
 0x7cc   : > { %3204 = vmatmul.mubr.msk.bf16.vlgmr.msra.gmra.mrb[20].mxu1 %vm1176_vm6, %v1136_v13 }
 0x7cd   : > { %3223 = vmatprep.mubr.msk.bf16.mxu1 %vm3970_vm0, %v3969_v0 }
 0x89f   : > { %v1214_v15 = vpop.f32.mrb[20].mxu1 }
 0x8a0   : > { %v1215_v16 = vadd.f32 %v2967_v14, %v1214_v15  ;;  %v3205_v17 = vpop.f32.mrb[21].mxu1 }
 0x8a1   : > { %v1217_v18 = vpop.f32.mrb[22].mxu1 }
 0x8a2   : > { %v1220_v19 = vadd.f32 %v1215_v16, %v1060_v57  ;;  %v3206_v20 = vpop.f32.mrb[23].mxu1 }
 0x8a4   : > { %v1221_v21 = vmul.f32 %v1220_v19, %v1220_v19 }
 0x8a6   : > { %v1222_v22 = vsel %vm490_vm1, %v1221_v21, 0.0 }
 0x8a7   : > { %1223 = vadd.xlane.f32.xlu0 %v1222_v22 }
 0x934   : > { %v1224_v25 = vpop.xlane.xlu0 %1223 }
 0x935   : > { %v1226_v26 = vmul.f32 0.03125, %v1224_v25 }
 0x937   : > { %v1227_v27 = vadd.f32 0.25, %v1226_v26 }
 0x939   : > { %3572 = vrsqrt.f32 %v1227_v27 }
 0x943   : > { %v3573_v28 = vpop.eup %3572 }
 0x944   : > { %v4489_v29 = vmul.f32 %v3573_v28, %v1220_v19 }
 0x946   : > { %v1230_v30 = vpack.c.bf16 %v4489_v29, %v4489_v29 }
 0x948   : > { %3212 = vmatmul.mubr.msk.bf16.vlgmr.msra.gmra.mrb[24].mxu0 %vm490_vm1, %v1230_v30 }
 0x949   : > { %3217 = vmatprep.mubr.msk.bf16.mxu0 %vm3970_vm0, %v3969_v0 }
 0xa1b   : > { %v1293_v32 = vpop.f32.mrb[24].mxu0 }
 0xa1c   : > { %v1294_v33 = vadd.f32 %v2973_v31, %v1293_v32  ;;  %v3213_v34 = vpop.f32.mrb[25].mxu0 }
 0xa1d   : > { %v1296_v35 = vpop.f32.mrb[26].mxu0 }
 0xa1e   : > { %v4496_v36 = vpack.c.bf16 %v1294_v33, %v1294_v33  ;;  %v3214_v37 = vpop.f32.mrb[27].mxu0 }
 0xa20   : > { %1301 = vrot.lane.b32.xlu1 %v4496_v36, %s3972_s20 }
 0xa24   : > { %1411 = vrot.lane.b32.xlu1 %v4496_v36, %s3974_s22 }
 0xa28   : > { %1409 = vrot.lane.b32.xlu1 %v4496_v36, %s3971_s16 }
 0xa2c   : > { %1521 = vrot.lane.b32.xlu1 %v4496_v36, %s3973_s26 }
 0xa30   : > { %1519 = vrot.lane.b32.xlu1 %v4496_v36, %s3976_s19 }
 0xa34   : > { %1631 = vrot.lane.b32.xlu1 %v4496_v36, %s3975_s25 }
 0xa38   : > { %1629 = vrot.lane.b32.xlu1 %v4496_v36, %s3977_s18 }
 0xa92   : > { %v1302_v38 = vpop.permute.xlu1 %1301 }
 0xa93   : > { %v1307_v39 = vsel %vm538_vm2, %v1302_v38, 0 }
 0xa94   : > { %3216 = vmatpush3.bf16.xpose.msra.mxu0 %v1307_v39 }
 0xa95   : > { %3227 = vmatprep.subr.bf16.mxu0 %v3969_v0 }
 0xa96   : > { %v1412_v40 = vpop.permute.xlu1 %1411 }
 0xa97   : > { %v1417_v42 = vsel %vm538_vm2, %v1412_v40, 0 }
 0xa9a   : > { %v1410_v41 = vpop.permute.xlu1 %1409 }
 0xa9b   : > { %3218 = vmatmul.mubr.msk.bf16.vlgmr.msra.gmra.mrb[28].mxu0 %vm538_vm2, %v4496_v36 }
 0xa9c   : > { %3228 = vmatpush3.bf16.xpose.msra.mxu0 %v1417_v42  ;;  %3229 = vmatprep.mubr.msk.bf16.mxu0 %vm3970_vm0, %v3969_v0 }
 0xa9d   : > { %3239 = vmatprep.subr.bf16.mxu0 %v3969_v0 }
 0xa9e   : > { %v1522_v43 = vpop.permute.xlu1 %1521 }
 0xa9f   : > { %v1527_v45 = vsel %vm538_vm2, %v1522_v43, 0 }
 0xaa2   : > { %v1520_v44 = vpop.permute.xlu1 %1519 }
 0xaa3   : > { %3230 = vmatmul.mubr.msk.bf16.vlgmr.msra.gmra.mrb[32].mxu0 %vm538_vm2, %v1410_v41 }
 0xaa4   : > { %3240 = vmatpush3.bf16.xpose.msra.mxu0 %v1527_v45  ;;  %3241 = vmatprep.mubr.msk.bf16.mxu0 %vm3970_vm0, %v3969_v0 }
 0xaa5   : > { %3251 = vmatprep.subr.bf16.mxu0 %v3969_v0 }
 0xaa6   : > { %v1632_v46 = vpop.permute.xlu1 %1631 }
 0xaa7   : > { %v1637_v47 = vsel %vm538_vm2, %v1632_v46, 0 }
 0xaaa   : > { %v1630_v48 = vpop.permute.xlu1 %1629 }
 0xaab   : > { %3242 = vmatmul.mubr.msk.bf16.vlgmr.msra.gmra.mrb[36].mxu0 %vm538_vm2, %v1520_v44 }
 0xaac   : > { %3252 = vmatpush3.bf16.xpose.msra.mxu0 %v1637_v47  ;;  %3253 = vmatprep.mubr.msk.bf16.mxu0 %vm3970_vm0, %v3969_v0 }
 0xaad   : > { %3263 = vmatprep.subr.bf16.mxu0 %v3969_v0 }
 0xab3   : > { %3254 = vmatmul.mubr.msk.bf16.vlgmr.msra.gmra.mrb[40].mxu0 %vm538_vm2, %v1630_v48 }
 0xab4   : > { %3267 = vmatprep.mubr.msk.bf16.mxu0 %vm3970_vm0, %v3969_v0 }
 0xb6e   : > { %v1343_v49 = vpop.f32.mrb[28].mxu0 }
 0xb6f   : > { %v3219_v50 = vpop.f32.mrb[29].mxu0  ;;  %v1349_v51 = vsel %vm538_vm2, %v1343_v49, -inf }
 0xb70   : > { %1350 = vmax.xlane.f32.xlu1 %v1349_v51  ;;  %v1346_v52 = vpop.f32.mrb[30].mxu0 }
 0xb71   : > { %v3220_v53 = vpop.f32.mrb[31].mxu0 }
 0xb76   : > { %v1453_v54 = vpop.f32.mrb[32].mxu0 }
 0xb77   : > { %v3231_v55 = vpop.f32.mrb[33].mxu0  ;;  %v1459_v56 = vsel %vm538_vm2, %v1453_v54, -inf }
 0xb78   : > { %1460 = vmax.xlane.f32.xlu0 %v1459_v56  ;;  %v1456_v57 = vpop.f32.mrb[34].mxu0  ;;  %v3534_v55 = vld [vmem:[#allocation8 + $0x10] sm:$0xff]  }
 0xb79   : > { %v3232_v58 = vpop.f32.mrb[35].mxu0  ;;  %3264 = vmatpush3.bf16.msra.mxu0 %v3534_v55 }
 0xb7a   : > { %3265 = vmatprep.subr.bf16.mxu0 %v3969_v0 }
 0xb7e   : > { %v1563_v59 = vpop.f32.mrb[36].mxu0 }
 0xb7f   : > { %v3243_v60 = vpop.f32.mrb[37].mxu0  ;;  %v1569_v61 = vsel %vm538_vm2, %v1563_v59, -inf }
 0xb80   : > { %1570 = vmax.xlane.f32.xlu0 %v1569_v61  ;;  %v1566_v62 = vpop.f32.mrb[38].mxu0  ;;  %v3535_v60 = vld [vmem:[#allocation8 + $0x18] sm:$0xff]  }
 0xb81   : > { %1471 = vrot.lane.b32.xlu1 %v4496_v36, %s3978_s23  ;;  %v3244_v3 = vpop.f32.mrb[39].mxu0  ;;  %3266 = vmatpush3.bf16.msra.mxu0 %v3535_v60 }
 0xb82   : > { %3279 = vmatprep.subr.bf16.mxu0 %v3969_v0 }
 0xb85   : > { %1691 = vrot.lane.b32.xlu1 %v4496_v36, %s3980_s17 }
 0xb86   : > { %v1673_v63 = vpop.f32.mrb[40].mxu0 }
 0xb87   : > { %v3255_v1 = vpop.f32.mrb[41].mxu0  ;;  %v1679_v2 = vsel %vm538_vm2, %v1673_v63, -inf }
 0xb88   : > { %1680 = vmax.xlane.f32.xlu0 %v1679_v2  ;;  %v1676_v4 = vpop.f32.mrb[42].mxu0 }
 0xb89   : > { %v3256_v5 = vpop.f32.mrb[43].mxu0 }
 0xb9e   : > { %1361 = vrot.lane.b32.xlu0 %v4496_v36, %s3979_s14 }
 0xbfd   : > { %v1351_v6 = vpop.xlane.xlu1 %1350 }
 0xbfe   : > { %v1352_v7 = vsub.f32 %v1343_v49, %v1351_v6 }
 0xc00   : > { %v1353_v8 = vmul.f32 1.442695, %v1352_v7 }
 0xc01   : > { %v1472_v33 = vpop.permute.xlu1 %1471 }
 0xc02   : > { %3574 = vpow2.f32 %v1353_v8  ;;  %v1477_v35 = vsel %vm602_vm3, %v1472_v33, 0 }
 0xc05   : > { %v1461_v9 = vpop.xlane.xlu0 %1460  ;;  %v1692_v45 = vpop.permute.xlu1 %1691 }
 0xc06   : > { %v1462_v11 = vsub.f32 %v1453_v54, %v1461_v9  ;;  %v1697_v47 = vsel %vm602_vm3, %v1692_v45, 0 }
 0xc08   : > { %v1463_v12 = vmul.f32 1.442695, %v1462_v11 }
 0xc0a   : > { %3576 = vpow2.f32 %v1463_v12 }
 0xc0c   : > { %v3575_v10 = vpop.eup %3574 }
 0xc0d   : > { %v1571_v13 = vpop.xlane.xlu0 %1570  ;;  %v1355_v14 = vsel %vm538_vm2, %v3575_v10, 0.0 }
 0xc0e   : > { %v1572_v15 = vsub.f32 %v1563_v59, %v1571_v13  ;;  %1356 = vadd.xlane.f32.xlu0 %v1355_v14  ;;  %v3536_v13 = vld [vmem:[#allocation11 + $0x10] sm:$0xff]   ;;  %v3537_v14 = vld [vmem:[#allocation11 + $0x18] sm:$0xff]  }
 0xc10   : > { %v1573_v16 = vmul.f32 1.442695, %v1572_v15  ;;  %v2985_v15 = vld [vmem:[#allocation10 + $0x1] ss:$0 sm:$0xff] }
 0xc12   : > { %3578 = vpow2.f32 %v1573_v16 }
 0xc14   : > { %v3577_v17 = vpop.eup %3576 }
 0xc15   : > { %v1681_v18 = vpop.xlane.xlu0 %1680  ;;  %v1465_v19 = vsel %vm538_vm2, %v3577_v17, 0.0 }
 0xc16   : > { %v1682_v20 = vsub.f32 %v1673_v63, %v1681_v18  ;;  %1466 = vadd.xlane.f32.xlu0 %v1465_v19 }
 0xc18   : > { %v1683_v21 = vmul.f32 1.442695, %v1682_v20 }
 0xc19   : > { %v1362_v22 = vpop.permute.xlu0 %1361 }
 0xc1a   : > { %3580 = vpow2.f32 %v1683_v21  ;;  %v1367_v23 = vsel %vm602_vm3, %v1362_v22, 0 }
 0xc1b   : > { %3222 = vmatpush3.bf16.msra.mxu1 %v1367_v23  ;;  %v3538_v23 = vld [vmem:[#allocation14 + $0x20] sm:$0xff]  }
 0xc1c   : > { %v3579_v24 = vpop.eup %3578  ;;  %3233 = vmatprep.subr.bf16.mxu1 %v3969_v0 }
 0xc1d   : > { %v1575_v25 = vsel %vm538_vm2, %v3579_v24, 0.0 }
 0xc1e   : > { %1576 = vadd.xlane.f32.xlu0 %v1575_v25  ;;  %v3540_v25 = vld [vmem:[#allocation14 + $0x30] sm:$0xff]  }
 0xc24   : > { %v3581_v26 = vpop.eup %3580 }
 0xc25   : > { %v1685_v27 = vsel %vm538_vm2, %v3581_v26, 0.0 }
 0xc26   : > { %1686 = vadd.xlane.f32.xlu0 %v1685_v27 }
 0xc3c   : > { %1581 = vrot.lane.b32.xlu0 %v4496_v36, %s3981_s3 }
 0xc9b   : > { %v1357_v28 = vpop.xlane.xlu0 %1356 }
 0xc9c   : > { %3582 = vrcp.f32 %v1357_v28 }
 0xca3   : > { %v1467_v30 = vpop.xlane.xlu0 %1466 }
 0xca4   : > { %3584 = vrcp.f32 %v1467_v30 }
 0xca6   : > { %v3583_v31 = vpop.eup %3582 }
 0xca7   : > { %v1359_v32 = vmul.f32 %v3583_v31, %v3575_v10 }
 0xca9   : > { %v1360_v34 = vpack.c.bf16 %v1359_v32, %v1359_v32 }
 0xcab   : > { %3224 = vmatmul.mubr.msk.bf16.vlgmr.msra.gmra.mrb[24].mxu1 %vm538_vm2, %v1360_v34  ;;  %v1577_v37 = vpop.xlane.xlu0 %1576 }
 0xcac   : > { %3234 = vmatpush3.bf16.msra.mxu1 %v1477_v35  ;;  %3586 = vrcp.f32 %v1577_v37  ;;  %3235 = vmatprep.mubr.msk.bf16.mxu1 %vm3970_vm0, %v3969_v0 }
 0xcad   : > { %3245 = vmatprep.subr.bf16.mxu1 %v3969_v0 }
 0xcae   : > { %v3585_v36 = vpop.eup %3584 }
 0xcaf   : > { %v1469_v38 = vmul.f32 %v3585_v36, %v3577_v17 }
 0xcb1   : > { %v1470_v39 = vpack.c.bf16 %v1469_v38, %v1469_v38 }
 0xcb3   : > { %3236 = vmatmul.mubr.msk.bf16.vlgmr.msra.gmra.mrb[28].mxu1 %vm538_vm2, %v1470_v39  ;;  %v1687_v40 = vpop.xlane.xlu0 %1686 }
 0xcb4   : > { %3588 = vrcp.f32 %v1687_v40  ;;  %3247 = vmatprep.mubr.msk.bf16.mxu1 %vm3970_vm0, %v3969_v0  ;;  %v2995_v40 = vld [vmem:[#allocation16 + $0x1] ss:$0 sm:$0xff] }
 0xcb6   : > { %v3587_v41 = vpop.eup %3586 }
 0xcb7   : > { %v1579_v42 = vmul.f32 %v3587_v41, %v3579_v24  ;;  %v1582_v43 = vpop.permute.xlu0 %1581  ;;  %v3539_v24 = vld [vmem:[#allocation14 + $0x28] sm:$0xff]  }
 0xcb8   : > { %v1587_v44 = vsel %vm602_vm3, %v1582_v43, 0 }
 0xcb9   : > { %3246 = vmatpush3.bf16.msra.mxu1 %v1587_v44  ;;  %v1580_v46 = vpack.c.bf16 %v1579_v42, %v1579_v42 }
 0xcba   : > { %3257 = vmatprep.subr.bf16.mxu1 %v3969_v0 }
 0xcbc   : > { %3248 = vmatmul.mubr.msk.bf16.vlgmr.msra.gmra.mrb[32].mxu1 %vm538_vm2, %v1580_v46 }
 0xcbd   : > { %3258 = vmatpush3.bf16.msra.mxu1 %v1697_v47  ;;  %3259 = vmatprep.mubr.msk.bf16.mxu1 %vm3970_vm0, %v3969_v0 }
 0xcbe   : > { %v3589_v48 = vpop.eup %3588  ;;  %3271 = vmatprep.subr.bf16.mxu1 %v3969_v0 }
 0xcbf   : > { %v1689_v49 = vmul.f32 %v3589_v48, %v3581_v26  ;;  %v2989_v26 = vld [vmem:[#allocation13 + $0x1] ss:$0 sm:$0xff] }
 0xcc1   : > { %v1690_v50 = vpack.c.bf16 %v1689_v49, %v1689_v49  ;;  %v3542_v49 = vld [vmem:[#allocation5 + $0x20] sm:$0xff]  }
 0xcc4   : > { %3260 = vmatmul.mubr.msk.bf16.vlgmr.msra.gmra.mrb[36].mxu1 %vm538_vm2, %v1690_v50  ;;  %v3543_v50 = vld [vmem:[#allocation5 + $0x28] sm:$0xff]  }
 0xcc5   : > { %3275 = vmatprep.mubr.msk.bf16.mxu1 %vm3970_vm0, %v3969_v0  ;;  %3272 = vmatpush3.bf16.msra.mxu1 %v3536_v13 }
 0xcc6   : > { %3273 = vmatprep.subr.bf16.mxu1 %v3969_v0 }
 0xcc9   : > { %3274 = vmatpush3.bf16.msra.mxu1 %v3537_v14 }
 0xcca   : > { %3291 = vmatprep.subr.bf16.mxu1 %v3969_v0 }
 0xd7e   : > { %v1403_v51 = vpop.f32.mrb[24].mxu1 }
 0xd7f   : > { %v3225_v52 = vpop.f32.mrb[25].mxu1 }
 0xd80   : > { %v1406_v53 = vpop.f32.mrb[26].mxu1 }
 0xd81   : > { %v3226_v54 = vpop.f32.mrb[27].mxu1 }
 0xd86   : > { %v1513_v56 = vpop.f32.mrb[28].mxu1 }
 0xd87   : > { %1740 = vrot.lane.b32.xlu0 %v1513_v56, %s3982_s13  ;;  %v3237_v57 = vpop.f32.mrb[29].mxu1 }
 0xd88   : > { %v1516_v58 = vpop.f32.mrb[30].mxu1  ;;  %v3001_v57 = vld [vmem:[#allocation7 + $0x2] ss:$0 sm:$0xff] }
 0xd89   : > { %v3238_v59 = vpop.f32.mrb[31].mxu1 }
 0xd8f   : > { %v1623_v61 = vpop.f32.mrb[32].mxu1 }
 0xd90   : > { %1744 = vrot.lane.b32.xlu1 %v1623_v61, %s3983_s24  ;;  %v3249_v62 = vpop.f32.mrb[33].mxu1 }
 0xd91   : > { %v1626_v3 = vpop.f32.mrb[34].mxu1 }
 0xd92   : > { %v3250_v63 = vpop.f32.mrb[35].mxu1 }
 0xd97   : > { %v1733_v1 = vpop.f32.mrb[36].mxu1 }
 0xd98   : > { %1748 = vrot.lane.b32.xlu0 %v1733_v1, %s3984_s29  ;;  %v3261_v2 = vpop.f32.mrb[37].mxu1 }
 0xd99   : > { %v1736_v4 = vpop.f32.mrb[38].mxu1 }
 0xd9a   : > { %v3262_v5 = vpop.f32.mrb[39].mxu1 }
 0xdf9   : > { %v1741_v6 = vpop.permute.xlu0 %1740 }
 0xdfa   : > { %v1751_v8 = vsel %vm538_vm2, %v1403_v51, %v1741_v6 }
 0xe02   : > { %v1745_v7 = vpop.permute.xlu1 %1744 }
 0xe03   : > { %v1752_v9 = vsel %vm989_vm4, %v1751_v8, %v1745_v7 }
 0xe0a   : > { %v1749_v11 = vpop.permute.xlu0 %1748 }
 0xe0b   : > { %v1753_v12 = vsel %vm991_vm5, %v1752_v9, %v1749_v11 }
 0xe0c   : > { %v1754_v10 = vpack.c.bf16 %v1753_v12, %v1753_v12 }
 0xe0e   : > { %3268 = vmatmul.mubr.msk.bf16.vlgmr.msra.gmra.mrb[44].mxu0 %vm490_vm1, %v1754_v10 }
 0xe0f   : > { %3287 = vmatprep.mubr.msk.bf16.mxu0 %vm3970_vm0, %v3969_v0  ;;  %3280 = vmatpush3.bf16.msra.mxu0 %v3538_v23 }
 0xe10   : > { %3281 = vmatprep.subr.bf16.mxu0 %v3969_v0 }
 0xe13   : > { %3282 = vmatpush3.bf16.msra.mxu0 %v3539_v24 }
 0xe14   : > { %3283 = vmatprep.subr.bf16.mxu0 %v3969_v0 }
 0xe17   : > { %3284 = vmatpush3.bf16.msra.mxu0 %v3540_v25 }
 0xe18   : > { %3285 = vmatprep.subr.bf16.mxu0 %v3969_v0 }
 0xee1   : > { %v1817_v16 = vpop.f32.mrb[44].mxu0 }
 0xee2   : > { %v1818_v17 = vadd.f32 %v2985_v15, %v1817_v16  ;;  %v3269_v18 = vpop.f32.mrb[45].mxu0 }
 0xee3   : > { %v1820_v19 = vpop.f32.mrb[46].mxu0 }
 0xee4   : > { %v1823_v20 = vadd.f32 %v1818_v17, %v4489_v29  ;;  %v3270_v21 = vpop.f32.mrb[47].mxu0  ;;  %v3541_v29 = vld [vmem:[#allocation14 + $0x38] sm:$0xff]  }
 0xee5   : > { %3286 = vmatpush3.bf16.msra.mxu0 %v3541_v29 }
 0xee6   : > { %v1824_v22 = vpack.c.bf16 %v1823_v20, %v1823_v20  ;;  %3305 = vmatprep.subr.bf16.mxu0 %v3969_v0 }
 0xee8   : > { %3276 = vmatmul.mubr.msk.bf16.vlgmr.msra.gmra.mrb[40].mxu1 %vm490_vm1, %v1824_v22 }
 0xee9   : > { %3295 = vmatprep.mubr.msk.bf16.mxu1 %vm3970_vm0, %v3969_v0  ;;  %3292 = vmatpush3.bf16.msra.mxu1 %v3542_v49 }
 0xeea   : > { %3293 = vmatprep.subr.bf16.mxu1 %v3969_v0 }
 0xeed   : > { %3294 = vmatpush3.bf16.msra.mxu1 %v3543_v50 }
 0xeee   : > { %3299 = vmatprep.subr.bf16.mxu1 %v3969_v0 }
 0xfbb   : > { %v1887_v27 = vpop.f32.mrb[40].mxu1 }
 0xfbc   : > { %v1888_v28 = vadd.f32 %v2989_v26, %v1887_v27  ;;  %v3277_v30 = vpop.f32.mrb[41].mxu1 }
 0xfbd   : > { %v1890_v31 = vpop.f32.mrb[42].mxu1 }
 0xfbe   : > { %v2993_v32 = vadd.f32 -1.0, %v1888_v28  ;;  %v3278_v33 = vpop.f32.mrb[43].mxu1 }
 0xfc0   : > { %v2994_v34 = vmul.f32 -1.442695, %v2993_v32 }
 0xfc2   : > { %3590 = vpow2.f32 %v2994_v34 }
 0xfcc   : > { %v3591_v35 = vpop.eup %3590 }
 0xfcd   : > { %v1897_v37 = vadd.f32 1.0, %v3591_v35 }
 0xfcf   : > { %3592 = vrcp.f32 %v1897_v37 }
 0xfd9   : > { %v3593_v36 = vpop.eup %3592 }
 0xfda   : > { %v1900_v38 = vmul.f32 %v3593_v36, %v1888_v28 }
 0xfdc   : > { %v1901_v39 = vpack.c.bf16 %v1900_v38, %v1900_v38 }
 0xfde   : > { %3288 = vmatmul.mubr.msk.bf16.vlgmr.msra.gmra.mrb[48].mxu0 %vm1176_vm6, %v1901_v39 }
 0xfdf   : > { %3307 = vmatprep.mubr.msk.bf16.mxu0 %vm3970_vm0, %v3969_v0 }
0x10b1   : > { %v1980_v41 = vpop.f32.mrb[48].mxu0 }
0x10b2   : > { %v1981_v42 = vadd.f32 %v2995_v40, %v1980_v41  ;;  %v3289_v43 = vpop.f32.mrb[49].mxu0 }
0x10b3   : > { %v1983_v44 = vpop.f32.mrb[50].mxu0 }
0x10b4   : > { %v1986_v45 = vadd.f32 %v1981_v42, %v1823_v20  ;;  %v3290_v46 = vpop.f32.mrb[51].mxu0 }
0x10b6   : > { %v1987_v47 = vmul.f32 %v1986_v45, %v1986_v45 }
0x10b8   : > { %v1988_v48 = vsel %vm490_vm1, %v1987_v47, 0.0 }
0x10b9   : > { %1989 = vadd.xlane.f32.xlu1 %v1988_v48 }
0x1146   : > { %v1990_v51 = vpop.xlane.xlu1 %1989 }
0x1147   : > { %v1991_v52 = vmul.f32 0.03125, %v1990_v51 }
0x1149   : > { %v1992_v53 = vadd.f32 0.25, %v1991_v52 }
0x114b   : > { %3594 = vrsqrt.f32 %v1992_v53 }
0x1155   : > { %v3595_v54 = vpop.eup %3594 }
0x1156   : > { %v4596_v55 = vmul.f32 %v3595_v54, %v1986_v45 }
0x1158   : > { %v1995_v56 = vpack.c.bf16 %v4596_v55, %v4596_v55 }
0x115a   : > { %3296 = vmatmul.mubr.msk.bf16.vlgmr.msra.gmra.mrb[44].mxu1 %vm490_vm1, %v1995_v56 }
0x115b   : > { %3301 = vmatprep.mubr.msk.bf16.mxu1 %vm3970_vm0, %v3969_v0 }
0x122d   : > { %v2058_v58 = vpop.f32.mrb[44].mxu1 }
0x122e   : > { %v2059_v59 = vadd.f32 %v3001_v57, %v2058_v58  ;;  %v3297_v60 = vpop.f32.mrb[45].mxu1 }
0x122f   : > { %v2061_v61 = vpop.f32.mrb[46].mxu1 }
0x1230   : > { %v4603_v62 = vpack.c.bf16 %v2059_v59, %v2059_v59  ;;  %v3298_v3 = vpop.f32.mrb[47].mxu1 }
0x1232   : > { %2066 = vrot.lane.b32.xlu0 %v4603_v62, %s3972_s20 }
0x1236   : > { %2176 = vrot.lane.b32.xlu0 %v4603_v62, %s3974_s22 }
0x123a   : > { %2174 = vrot.lane.b32.xlu0 %v4603_v62, %s3971_s16  ;;  %s4784_s16 = sshll.u32 %s4348_s21, 3 }
0x123b   : > { %s463_s20 = scalar_lea.vmem [#allocation17], %s4784_s16 }
0x123e   : > { %2286 = vrot.lane.b32.xlu0 %v4603_v62, %s3973_s26  ;;  %s2775_s26 = sshll.u32 %s463_s20, 4  ;;  %s4703_s26 = int_to_ptr.vmem [resolvable:$true] %s2775_s26 }
0x1242   : > { %2284 = vrot.lane.b32.xlu0 %v4603_v62, %s3976_s19  ;;  %s4785_s19 = sld [smem:[#allocation26_spill]] }
0x1246   : > { %2396 = vrot.lane.b32.xlu0 %v4603_v62, %s3975_s25 }
0x124a   : > { %2394 = vrot.lane.b32.xlu0 %v4603_v62, %s3977_s18 }
0x12a4   : > { %v2067_v63 = vpop.permute.xlu0 %2066 }
0x12a5   : > { %v2072_v1 = vsel %vm538_vm2, %v2067_v63, 0 }
0x12a6   : > { %3300 = vmatpush3.bf16.xpose.msra.mxu1 %v2072_v1 }
0x12a7   : > { %3311 = vmatprep.subr.bf16.mxu1 %v3969_v0 }
0x12a8   : > { %v2177_v2 = vpop.permute.xlu0 %2176 }
0x12a9   : > { %v2182_v5 = vsel %vm538_vm2, %v2177_v2, 0 }
0x12ac   : > { %v2175_v4 = vpop.permute.xlu0 %2174 }
0x12ad   : > { %3302 = vmatmul.mubr.msk.bf16.vlgmr.msra.gmra.mrb[48].mxu1 %vm538_vm2, %v4603_v62 }
0x12ae   : > { %3312 = vmatpush3.bf16.xpose.msra.mxu1 %v2182_v5  ;;  %3313 = vmatprep.mubr.msk.bf16.mxu1 %vm3970_vm0, %v3969_v0 }
0x12af   : > { %3323 = vmatprep.subr.bf16.mxu1 %v3969_v0 }
0x12b0   : > { %v2287_v6 = vpop.permute.xlu0 %2286 }
0x12b1   : > { %v2292_v8 = vsel %vm538_vm2, %v2287_v6, 0 }
0x12b4   : > { %v2285_v7 = vpop.permute.xlu0 %2284 }
0x12b5   : > { %3314 = vmatmul.mubr.msk.bf16.vlgmr.msra.gmra.mrb[52].mxu1 %vm538_vm2, %v2175_v4 }
0x12b6   : > { %3324 = vmatpush3.bf16.xpose.msra.mxu1 %v2292_v8  ;;  %3325 = vmatprep.mubr.msk.bf16.mxu1 %vm3970_vm0, %v3969_v0 }
0x12b7   : > { %3335 = vmatprep.subr.bf16.mxu1 %v3969_v0 }
0x12b8   : > { %v2397_v9 = vpop.permute.xlu0 %2396 }
0x12b9   : > { %v2402_v11 = vsel %vm538_vm2, %v2397_v9, 0 }
0x12bc   : > { %v2395_v12 = vpop.permute.xlu0 %2394 }
0x12bd   : > { %3326 = vmatmul.mubr.msk.bf16.vlgmr.msra.gmra.mrb[56].mxu1 %vm538_vm2, %v2285_v7 }
0x12be   : > { %3336 = vmatpush3.bf16.xpose.msra.mxu1 %v2402_v11  ;;  %3337 = vmatprep.mubr.msk.bf16.mxu1 %vm3970_vm0, %v3969_v0 }
0x12bf   : > { %3347 = vmatprep.subr.bf16.mxu1 %v3969_v0 }
0x12c5   : > { %3338 = vmatmul.mubr.msk.bf16.vlgmr.msra.gmra.mrb[60].mxu1 %vm538_vm2, %v2395_v12 }
0x12c6   : > { %3351 = vmatprep.mubr.msk.bf16.mxu1 %vm3970_vm0, %v3969_v0 }
0x1380   : > { %v2108_v10 = vpop.f32.mrb[48].mxu1 }
0x1381   : > { %v3303_v13 = vpop.f32.mrb[49].mxu1  ;;  %v2114_v14 = vsel %vm538_vm2, %v2108_v10, -inf }
0x1382   : > { %2115 = vmax.xlane.f32.xlu0 %v2114_v14  ;;  %v2111_v15 = vpop.f32.mrb[50].mxu1 }
0x1383   : > { %v3304_v16 = vpop.f32.mrb[51].mxu1 }
0x1388   : > { %v2218_v17 = vpop.f32.mrb[52].mxu1 }
0x1389   : > { %v3315_v18 = vpop.f32.mrb[53].mxu1  ;;  %v2224_v19 = vsel %vm538_vm2, %v2218_v17, -inf }
0x138a   : > { %2225 = vmax.xlane.f32.xlu1 %v2224_v19  ;;  %v2221_v20 = vpop.f32.mrb[54].mxu1  ;;  %v3544_v18 = vld [vmem:[#allocation8 + $0x20] sm:$0xff]  }
0x138b   : > { %v3316_v21 = vpop.f32.mrb[55].mxu1  ;;  %3348 = vmatpush3.bf16.msra.mxu1 %v3544_v18 }
0x138c   : > { %3349 = vmatprep.subr.bf16.mxu1 %v3969_v0 }
0x1390   : > { %v2328_v22 = vpop.f32.mrb[56].mxu1 }
0x1391   : > { %v3327_v23 = vpop.f32.mrb[57].mxu1  ;;  %v2334_v24 = vsel %vm538_vm2, %v2328_v22, -inf }
0x1392   : > { %2335 = vmax.xlane.f32.xlu1 %v2334_v24  ;;  %v2331_v25 = vpop.f32.mrb[58].mxu1  ;;  %v3545_v23 = vld [vmem:[#allocation8 + $0x28] sm:$0xff]  }
0x1393   : > { %v3328_v29 = vpop.f32.mrb[59].mxu1  ;;  %3350 = vmatpush3.bf16.msra.mxu1 %v3545_v23 }
0x1394   : > { %3363 = vmatprep.subr.bf16.mxu1 %v3969_v0 }
0x1398   : > { %2126 = vrot.lane.b32.xlu0 %v4603_v62, %s3979_s14  ;;  %v2438_v26 = vpop.f32.mrb[60].mxu1  ;;  %s3872_s14 = scalar_lea.vmem %s4703_s26, 128 }
0x1399   : > { %v3339_v27 = vpop.f32.mrb[61].mxu1  ;;  %v2444_v28 = vsel %vm538_vm2, %v2438_v26, -inf  ;;  %p3873_p12 = scmp.ne.s32.totalorder %s4703_s26, %s3872_s14 }
0x139a   : > { %2445 = vmax.xlane.f32.xlu1 %v2444_v28  ;;  %v2441_v30 = vpop.f32.mrb[62].mxu1 }
0x139b   : > { %v3340_v31 = vpop.f32.mrb[63].mxu1  ;;  %p3874_p13 = pnand %p3873_p12, %p4786_p1 }
0x139c   : > { %2456 = vrot.lane.b32.xlu0 %v4603_v62, %s3980_s17 }
0x139d   : > { %p3875_p0 = pneg %p3874_p13 }
0x13ab   : > { %2236 = vrot.lane.b32.xlu1 %v4603_v62, %s3978_s23  ;;  %s2762_s23 = scalar_lea.sflag [#allocation4], %s4348_s21 }
0x140f   : > { %v2116_v32 = vpop.xlane.xlu0 %2115 }
0x1410   : > { %v2117_v33 = vsub.f32 %v2108_v10, %v2116_v32 }
0x1412   : > { %v2118_v34 = vmul.f32 1.442695, %v2117_v33 }
0x1413   : > { %v2127_v35 = vpop.permute.xlu0 %2126 }
0x1414   : > { %3596 = vpow2.f32 %v2118_v34  ;;  %v2132_v37 = vsel %vm602_vm3, %v2127_v35, 0 }
0x1415   : > { %3306 = vmatpush3.bf16.msra.mxu0 %v2132_v37 }
0x1416   : > { %3317 = vmatprep.subr.bf16.mxu0 %v3969_v0 }
0x1417   : > { %v2226_v36 = vpop.xlane.xlu1 %2225  ;;  %v2457_v8 = vpop.permute.xlu0 %2456 }
0x1418   : > { %v2227_v38 = vsub.f32 %v2218_v17, %v2226_v36  ;;  %v2462_v11 = vsel %vm602_vm3, %v2457_v8, 0 }
0x141a   : > { %v2228_v39 = vmul.f32 1.442695, %v2227_v38 }
0x141c   : > { %3598 = vpow2.f32 %v2228_v39  ;;  %v3546_v39 = vld [vmem:[#allocation11 + $0x20] sm:$0xff]  }
0x141e   : > { %v3597_v40 = vpop.eup %3596 }
0x141f   : > { %v2336_v41 = vpop.xlane.xlu1 %2335  ;;  %v2120_v42 = vsel %vm538_vm2, %v3597_v40, 0.0 }
0x1420   : > { %v2337_v43 = vsub.f32 %v2328_v22, %v2336_v41  ;;  %2121 = vadd.xlane.f32.xlu1 %v2120_v42  ;;  %v3013_v41 = vld [vmem:[#allocation10 + $0x2] ss:$0 sm:$0xff] }
0x1422   : > { %v2338_v44 = vmul.f32 1.442695, %v2337_v43 }
0x1424   : > { %3600 = vpow2.f32 %v2338_v44 }
0x1426   : > { %v3599_v45 = vpop.eup %3598 }
0x1427   : > { %v2446_v46 = vpop.xlane.xlu1 %2445  ;;  %v2230_v47 = vsel %vm538_vm2, %v3599_v45, 0.0 }
0x1428   : > { %v2447_v48 = vsub.f32 %v2438_v26, %v2446_v46  ;;  %2231 = vadd.xlane.f32.xlu1 %v2230_v47 }
0x142a   : > { %v2448_v49 = vmul.f32 1.442695, %v2447_v48 }
0x142b   : > { %v2237_v54 = vpop.permute.xlu1 %2236 }
0x142c   : > { %3602 = vpow2.f32 %v2448_v49  ;;  %v2242_v61 = vsel %vm602_vm3, %v2237_v54, 0  ;;  %v3548_v49 = vld [vmem:[#allocation14 + $0x40] sm:$0xff]  }
0x142e   : > { %v3601_v50 = vpop.eup %3600 }
0x142f   : > { %v2340_v51 = vsel %vm538_vm2, %v3601_v50, 0.0 }
0x1430   : > { %2341 = vadd.xlane.f32.xlu1 %v2340_v51  ;;  %v3550_v51 = vld [vmem:[#allocation14 + $0x50] sm:$0xff]  }
0x1436   : > { %v3603_v52 = vpop.eup %3602 }
0x1437   : > { %v2450_v53 = vsel %vm538_vm2, %v3603_v52, 0.0 }
0x1438   : > { %2451 = vadd.xlane.f32.xlu1 %v2450_v53  ;;  %v3017_v53 = vld [vmem:[#allocation13 + $0x2] ss:$0 sm:$0xff] }
0x1449   : > { %2346 = vrot.lane.b32.xlu1 %v4603_v62, %s3981_s3 }
0x14ad   : > { %v2122_v56 = vpop.xlane.xlu1 %2121 }
0x14ae   : > { %3604 = vrcp.f32 %v2122_v56 }
0x14b5   : > { %v2232_v57 = vpop.xlane.xlu1 %2231 }
0x14b6   : > { %3606 = vrcp.f32 %v2232_v57 }
0x14b8   : > { %v3605_v58 = vpop.eup %3604 }
0x14b9   : > { %v2124_v59 = vmul.f32 %v3605_v58, %v3597_v40  ;;  %v3547_v40 = vld [vmem:[#allocation11 + $0x28] sm:$0xff]  }
0x14bb   : > { %v2125_v60 = vpack.c.bf16 %v2124_v59, %v2124_v59 }
0x14bd   : > { %3308 = vmatmul.mubr.msk.bf16.vlgmr.msra.gmra.mrb[52].mxu0 %vm538_vm2, %v2125_v60  ;;  %v2342_v3 = vpop.xlane.xlu1 %2341 }
0x14be   : > { %3318 = vmatpush3.bf16.msra.mxu0 %v2242_v61  ;;  %3608 = vrcp.f32 %v2342_v3  ;;  %3319 = vmatprep.mubr.msk.bf16.mxu0 %vm3970_vm0, %v3969_v0 }
0x14bf   : > { %3329 = vmatprep.subr.bf16.mxu0 %v3969_v0 }
0x14c0   : > { %v3607_v62 = vpop.eup %3606 }
0x14c1   : > { %v2234_v63 = vmul.f32 %v3607_v62, %v3599_v45 }
0x14c3   : > { %v2235_v1 = vpack.c.bf16 %v2234_v63, %v2234_v63 }
0x14c5   : > { %3320 = vmatmul.mubr.msk.bf16.vlgmr.msra.gmra.mrb[56].mxu0 %vm538_vm2, %v2235_v1  ;;  %v2452_v2 = vpop.xlane.xlu1 %2451 }
0x14c6   : > { %3610 = vrcp.f32 %v2452_v2  ;;  %3331 = vmatprep.mubr.msk.bf16.mxu0 %vm3970_vm0, %v3969_v0 }
0x14c8   : > { %v3609_v4 = vpop.eup %3608 }
0x14c9   : > { %v2344_v5 = vmul.f32 %v3609_v4, %v3601_v50  ;;  %v2347_v6 = vpop.permute.xlu1 %2346  ;;  %v3549_v50 = vld [vmem:[#allocation14 + $0x48] sm:$0xff]  }
0x14ca   : > { %v2352_v7 = vsel %vm602_vm3, %v2347_v6, 0 }
0x14cb   : > { %3330 = vmatpush3.bf16.msra.mxu0 %v2352_v7  ;;  %v2345_v9 = vpack.c.bf16 %v2344_v5, %v2344_v5 }
0x14cc   : > { %3341 = vmatprep.subr.bf16.mxu0 %v3969_v0 }
0x14ce   : > { %3332 = vmatmul.mubr.msk.bf16.vlgmr.msra.gmra.mrb[60].mxu0 %vm538_vm2, %v2345_v9 }
0x14cf   : > { %3342 = vmatpush3.bf16.msra.mxu0 %v2462_v11  ;;  %3343 = vmatprep.mubr.msk.bf16.mxu0 %vm3970_vm0, %v3969_v0 }
0x14d0   : > { %v3611_v12 = vpop.eup %3610  ;;  %3355 = vmatprep.subr.bf16.mxu0 %v3969_v0 }
0x14d1   : > { %v2454_v10 = vmul.f32 %v3611_v12, %v3603_v52  ;;  %v3551_v52 = vld [vmem:[#allocation14 + $0x58] sm:$0xff]  }
0x14d3   : > { %v2455_v13 = vpack.c.bf16 %v2454_v10, %v2454_v10 }
0x14d6   : > { %3344 = vmatmul.mubr.msk.bf16.vlgmr.msra.gmra.mrb[64].mxu0 %vm538_vm2, %v2455_v13 }
0x14d7   : > { %3359 = vmatprep.mubr.msk.bf16.mxu0 %vm3970_vm0, %v3969_v0  ;;  %3356 = vmatpush3.bf16.msra.mxu0 %v3546_v39 }
0x14d8   : > { %3357 = vmatprep.subr.bf16.mxu0 %v3969_v0 }
0x14db   : > { %3358 = vmatpush3.bf16.msra.mxu0 %v3547_v40 }
0x1590   : > { %v2168_v14 = vpop.f32.mrb[52].mxu0 }
0x1591   : > { %v3309_v15 = vpop.f32.mrb[53].mxu0 }
0x1592   : > { %v2171_v16 = vpop.f32.mrb[54].mxu0 }
0x1593   : > { %v3310_v17 = vpop.f32.mrb[55].mxu0 }
0x1598   : > { %v2278_v19 = vpop.f32.mrb[56].mxu0 }
0x1599   : > { %2505 = vrot.lane.b32.xlu1 %v2278_v19, %s3982_s13  ;;  %v3321_v20 = vpop.f32.mrb[57].mxu0 }
0x159a   : > { %v2281_v21 = vpop.f32.mrb[58].mxu0 }
0x159b   : > { %v3322_v22 = vpop.f32.mrb[59].mxu0 }
0x15a1   : > { %v2388_v24 = vpop.f32.mrb[60].mxu0 }
0x15a2   : > { %2509 = vrot.lane.b32.xlu0 %v2388_v24, %s3983_s24  ;;  %v3333_v25 = vpop.f32.mrb[61].mxu0 }
0x15a3   : > { %v2391_v29 = vpop.f32.mrb[62].mxu0 }
0x15a4   : > { %v3334_v26 = vpop.f32.mrb[63].mxu0 }
0x15a9   : > { %v2498_v27 = vpop.f32.mrb[64].mxu0 }
0x15aa   : > { %2513 = vrot.lane.b32.xlu1 %v2498_v27, %s3984_s29  ;;  %v3345_v28 = vpop.f32.mrb[65].mxu0  ;;  %s3030_s29 = sshll.u32 %s4057_s15, 7  ;;  %s3985_s15 = smov [#allocation17]  }
0x15ab   : > { %v2501_v30 = vpop.f32.mrb[66].mxu0  ;;  %s4701_s18 = scalar_lea.hbm %s4785_s19, %s3030_s29  ;;  %s3876_s17 = sshll.u32 %s3985_s15, 4  ;;  %s3877_s17 = int_to_ptr.vmem [resolvable:$false] %s3876_s17 }
0x15ac   : > { %v3346_v31 = vpop.f32.mrb[67].mxu0  ;;  %s3878_s3 = scalar_lea.vmem %s3877_s17, 256  ;;  %p3879_p2 = scmp.lt.s32.totalorder %s4703_s26, %s3877_s17 }
0x15ad   : > { %p3880_p3 = scmp.lt.s32.totalorder %s3878_s3, %s3872_s14 }
0x15af   : > { %p3881_p4 = por %p3880_p3, %p3879_p2 }
0x15b1   : > { %p3882_p10 = pnand %p3881_p4, %p3875_p0 }
0x160b   : > { %v2506_v32 = vpop.permute.xlu1 %2505 }
0x160c   : > { %v2516_v34 = vsel %vm538_vm2, %v2168_v14, %v2506_v32 }
0x1614   : > { %v2510_v33 = vpop.permute.xlu0 %2509 }
0x1615   : > { %v2517_v35 = vsel %vm989_vm4, %v2516_v34, %v2510_v33 }
0x161c   : > { %v2514_v37 = vpop.permute.xlu1 %2513 }
0x161d   : > { %v2518_v36 = vsel %vm991_vm5, %v2517_v35, %v2514_v37 }
0x161e   : > { %v2519_v38 = vpack.c.bf16 %v2518_v36, %v2518_v36 }
0x1620   : > { %3352 = vmatmul.mubr.msk.bf16.vlgmr.msra.gmra.mrb[64].mxu1 %vm490_vm1, %v2519_v38 }
0x1621   : > { %3371 = vmatprep.mubr.msk.bf16.mxu1 %vm3970_vm0, %v3969_v0  ;;  %3364 = vmatpush3.bf16.msra.mxu1 %v3548_v49 }
0x1622   : > { %3365 = vmatprep.subr.bf16.mxu1 %v3969_v0 }
0x1625   : > { %3366 = vmatpush3.bf16.msra.mxu1 %v3549_v50 }
0x1626   : > { %3367 = vmatprep.subr.bf16.mxu1 %v3969_v0 }
0x1629   : > { %3368 = vmatpush3.bf16.msra.mxu1 %v3550_v51 }
0x162a   : > { %3369 = vmatprep.subr.bf16.mxu1 %v3969_v0  ;;  %v3023_v0 = vld [vmem:[#allocation16 + $0x2] ss:$0 sm:$0xff] }
0x162d   : > { %3370 = vmatpush3.bf16.msra.mxu1 %v3551_v52 }
0x16f3   : > { %v2582_v42 = vpop.f32.mrb[64].mxu1 }
0x16f4   : > { %v2583_v43 = vadd.f32 %v3013_v41, %v2582_v42  ;;  %v3353_v44 = vpop.f32.mrb[65].mxu1 }
0x16f5   : > { %v2585_v45 = vpop.f32.mrb[66].mxu1 }
0x16f6   : > { %v2588_v46 = vadd.f32 %v2583_v43, %v4596_v55  ;;  %v3354_v47 = vpop.f32.mrb[67].mxu1 }
0x16f8   : > { %v2589_v48 = vpack.c.bf16 %v2588_v46, %v2588_v46 }
0x16fa   : > { %3360 = vmatmul.mubr.msk.bf16.vlgmr.msra.gmra.mrb[68].mxu0 %vm490_vm1, %v2589_v48 }
0x17cd   : > { %v2652_v55 = vpop.f32.mrb[68].mxu0 }
0x17ce   : > { %v2653_v54 = vadd.f32 %v3017_v53, %v2652_v55  ;;  %v3361_v56 = vpop.f32.mrb[69].mxu0 }
0x17cf   : > { %v2655_v57 = vpop.f32.mrb[70].mxu0 }
0x17d0   : > { %v3021_v58 = vadd.f32 -1.0, %v2653_v54  ;;  %v3362_v59 = vpop.f32.mrb[71].mxu0 }
0x17d2   : > { %v3022_v60 = vmul.f32 -1.442695, %v3021_v58 }
0x17d4   : > { %3612 = vpow2.f32 %v3022_v60 }
0x17de   : > { %v3613_v61 = vpop.eup %3612 }
0x17df   : > { %v2662_v3 = vadd.f32 1.0, %v3613_v61 }
0x17e1   : > { %3614 = vrcp.f32 %v2662_v3 }
0x17eb   : > { %v3615_v62 = vpop.eup %3614 }
0x17ec   : > { %v2665_v63 = vmul.f32 %v3615_v62, %v2653_v54 }
0x17ee   : > { %v2666_v1 = vpack.c.bf16 %v2665_v63, %v2665_v63 }
0x17f0   : > { %3372 = vmatmul.mubr.msk.bf16.vlgmr.msra.gmra.mrb[68].mxu1 %vm1176_vm6, %v2666_v1 }
0x18c3   : > { %v2745_v2 = vpop.f32.mrb[68].mxu1 }
0x18c4   : > { %v2746_v4 = vadd.f32 %v3023_v0, %v2745_v2  ;;  %v3373_v5 = vpop.f32.mrb[69].mxu1 }
0x18c5   : > { %v2748_v6 = vpop.f32.mrb[70].mxu1 }
0x18c6   : > { %v2751_v7 = vadd.f32 %v2746_v4, %v2588_v46  ;;  %v3374_v8 = vpop.f32.mrb[71].mxu1 }
0x18c8   : > { %v2752_v9 = vmul.f32 %v2751_v7, %v2751_v7 }
0x18ca   : > { %v2753_v11 = vsel %vm490_vm1, %v2752_v9, 0.0 }
0x18cb   : > { %2754 = vadd.xlane.f32.xlu0 %v2753_v11 }
0x1958   : > { %v2755_v12 = vpop.xlane.xlu0 %2754 }
0x1959   : > { %v2756_v10 = vmul.f32 0.03125, %v2755_v12 }
0x195b   : > { %v2757_v13 = vadd.f32 0.25, %v2756_v10 }
0x195d   : > { %3616 = vrsqrt.f32 %v2757_v13 }
0x1967   : > { %v3617_v14 = vpop.eup %3616 }
0x1968   : > { %v2759_v15 = vmul.f32 %v3617_v14, %v2751_v7 }
0x196a   : > { %2760 = vst.msk [vmem:[%s463_s20] sm:$0xff] %vm490_vm1, %v2759_v15 }
0x196b   : > { %3885 = shalt.err (!%p3882_p10)
}
0x196c   : > { %s3886_s21 = scalar_lea.hbm %s4701_s18, 128  ;;  %s3890_s29 = scalar_lea.hbm %s4785_s19, 256 }
0x196d   : > { %p3887_p11 = scmp.ne.s32.totalorder %s4701_s18, %s3886_s21  ;;  %p3891_p7 = scmp.lt.u32.totalorder %s4701_s18, %s4785_s19 }
0x196e   : > { %p3892_p6 = scmp.lt.u32.totalorder %s3890_s29, %s3886_s21  ;;  %p3894_p12 = scmp.lt.u32.totalorder %s3886_s21, %s4701_s18 }
0x196f   : > { %p3888_p8 = pnand %p3887_p11, %p4786_p1 }
0x1970   : > { %p3893_p9 = por %p3892_p6, %p3891_p7 }
0x1971   : > { %p3889_p5 = pneg %p3888_p8 }
0x1972   : > { %p3895_p13 = por %p3894_p12, %p3893_p9 }
0x1974   : > { %p3896_p0 = pnand %p3895_p13, %p3889_p5 }
0x1976   : > { %3899 = shalt.err (!%p3896_p0)
}
0x1977   : > { %3409 = dma.vmem_to_hbm [thread:$0]  (%p4786_p1), %s4703_s26, 128, %s4701_s18, %s2762_s23  }
0x1978 PF: > { %s2787_s22 = sand.u32 1, %s3942_s30   ;;  %p4787_p2 = scmp.ne.s32.totalorder %s4773_s28, 0 }
0x1979   : > { %p4788_p3 = scmp.ge.s32.totalorder %s3954_s12, 2  ;;  %s2788_s25 = scalar_lea.sflag [#allocation4], %s2787_s22 }
0x197b   : > { %p3441_p4 = pnand %p4788_p3, %p4787_p2 }
0x197d   : > { %3937 = dma.done.wait (!%p3441_p4), %s2788_s25, 128  }
0x197e   : > { %3939 = vsyncadd (!%p3441_p4), %s2788_s25, 4294967168  ;;  %p26_p10 = scmp.ge.s32.totalorder %s4272_s27, 4   ;;  %s4789_s30 = smov %s3946_s10 }
0x197f   : > { %s4790_s10 = smov %s3950_s11  ;;  %s4791_s11 = smov %s4283_s9 }
0x1980   : > { %s4792_s12 = smov %s4272_s27  ;;  %28 = sbr.rel (!%p26_p10) target bundleno = 13 (0xd), region = 149 }
0x1987   :  { %2793 = vsyncpa [#allocation3], 1 }
0x1988   :  { %2795 = vsyncpa [#allocation3 + $0x1], 1 }
0x1989   :  { %2796 = vsyncpa [#allocation6], 1 }
0x198a   :  { %2797 = vsyncpa [#allocation9], 1 }
0x198b   :  { %2798 = vsyncpa [#allocation12], 1 }
0x198c   :  { %2799 = vsyncpa [#allocation15], 1 }
0x198d   :  { %2800 = vsyncpa [#allocation4], 1 }
0x198e   :  { %2802 = vsyncpa [#allocation4 + $0x1], 1 }

</bundles_post_ra>
